<compile_context>
chip_gen: v5e
topology: v5e:2x2
jax: 0.10.0
libtpu: 0.0.40
codegen_flags: <defaults>
</compile_context>

<pallas_src>
import functools

import jax
import jax.numpy as jnp
import numpy as np
from jax.experimental import pallas as pl
from jax.experimental.pallas import tpu as pltpu

F = 128  # PaiNN feature dim (module default f=128); multiple of 128 lanes


def _round_up(x, m):
    return ((x + m - 1) // m) * m


def update_kernel(v_ref, s_ref, wvu_ref, w1t_ref, b1_ref, w2t_ref, b2_ref,
                  outv_ref, outs_ref):
    f = s_ref.shape[-1]
    wdt = wvu_ref.dtype

    # Per-spatial-component fused V/U matmul; accumulate ||Vv||^2 and <U(Vv), Vv>.
    norm_sq = None
    dot_uv = None
    for c in range(3):  # static unroll; components are 128-aligned lane slabs of v_ref
        sl = slice(c * f, (c + 1) * f)
        vu = jnp.dot(v_ref[:, sl].astype(wdt), wvu_ref[...],
                     preferred_element_type=jnp.float32)          # (TN, 2F) = [Vv | U(Vv)]
        vc = vu[:, :f]
        uc = vu[:, f:]
        outv_ref[:, sl] = uc.astype(outv_ref.dtype)               # stash u; scaled by split[0] later
        if c == 0:
            norm_sq = vc * vc
            dot_uv = uc * vc
        else:
            norm_sq = norm_sq + vc * vc
            dot_uv = dot_uv + uc * vc

    vnorm = jnp.sqrt(norm_sq)                                     # torch.norm(v, dim=1)

    # a-MLP layer 1: cat([vnorm, s], lane axis) @ W1^T as a single K=2F matmul (f32 accumulate).
    h_in = jnp.concatenate([vnorm.astype(wdt), s_ref[...].astype(wdt)], axis=-1)
    pre = jnp.dot(h_in, w1t_ref[...],
                  preferred_element_type=jnp.float32) + b1_ref[...]
    h = pre * jax.nn.sigmoid(pre)                                 # SiLU

    # a-MLP layer 2: all three heads fused into one N=3F matmul.
    heads = jnp.dot(h.astype(wdt), w2t_ref[...],
                    preferred_element_type=jnp.float32) + b2_ref[...]
    a_vv = heads[:, :f]
    a_sv = heads[:, f:2 * f]
    a_ss = heads[:, 2 * f:]

    for c in range(3):
        sl = slice(c * f, (c + 1) * f)
        outv_ref[:, sl] = (outv_ref[:, sl].astype(jnp.float32) * a_vv).astype(outv_ref.dtype)
    outs_ref[...] = (dot_uv * a_sv + a_ss).astype(outs_ref.dtype)


def make_params(key, f=F):
    ks = jax.random.split(key, 6)
    sc = 0.05
    Wv = jax.random.normal(ks[0], (f, f), jnp.float32) * sc        # nn.Linear(f, f, bias=False)
    Wu = jax.random.normal(ks[1], (f, f), jnp.float32) * sc        # nn.Linear(f, f, bias=False)
    W1 = jax.random.normal(ks[2], (f, 2 * f), jnp.float32) * sc    # nn.Linear(2f, f)
    b1 = jax.random.normal(ks[3], (f,), jnp.float32) * sc
    W2 = jax.random.normal(ks[4], (3 * f, f), jnp.float32) * sc    # nn.Linear(f, 3f)
    b2 = jax.random.normal(ks[5], (3 * f,), jnp.float32) * sc
    return Wv, Wu, W1, b1, W2, b2


def update_pallas(s, v, params, *, tile_n=1024, weights_dtype=jnp.bfloat16):
    """s: (N, 1, F), v: (N, 3, F)  -> (out_v (N, 3, F), out_s (N, 1, F)), matching PyTorch."""
    Wv, Wu, W1, b1, W2, b2 = params
    n, _, f = v.shape

    # Flatten the spatial components onto the lane axis (contiguous -> free reshapes, no transpose).
    v2d = v.reshape(n, 3 * f)
    s2d = s.reshape(n, f)
    v_b = jnp.dtype(v.dtype).itemsize
    s_b = jnp.dtype(s.dtype).itemsize
    w_b = jnp.dtype(weights_dtype).itemsize

    # ---- choose atom tile ---------------------------------------------------------------------
    tile_n = max(8, (int(tile_n) // 8) * 8)          # sublane multiple
    tile_n = min(tile_n, _round_up(n, 8))            # no bigger than (rounded-up) N

    # VMEM budget: double-buffered I/O blocks + f32 intermediates + (conservatively doubled) weights.
    w_bytes = 2 * (((f * 2 * f) + (2 * f * f) + (f * 3 * f)) * w_b + 4 * f * 4)

    def _vmem_est(t):
        io = 2 * t * (3 * f * v_b + f * s_b)         # v + s blocks, double-buffered
        io += 2 * t * (3 * f * v_b + f * s_b)        # out_v + out_s blocks, double-buffered
        tmp = t * (10 * f) * 4                       # vu, h_in, pre/h, heads, norm_sq, dot_uv (f32)
        return io + tmp + w_bytes

    while tile_n > 8 and _vmem_est(tile_n) > 40 * (1 << 20):
        tile_n = max(8, ((tile_n // 2) // 8) * 8)

    # v7x: keep grid >= 2 when possible so the "parallel" axis shards across both TensorCores.
    if n > 8 and pl.cdiv(n, tile_n) < 2:
        tile_n = max(8, _round_up(pl.cdiv(n, 2), 8))

    grid_n = pl.cdiv(n, tile_n)                      # ragged last block handled by Pallas masking
    vmem_limit = int(min(max(int(_vmem_est(tile_n) * 1.3), 16 * (1 << 20)), 56 * (1 << 20)))

    # ---- weight prep (tiny, once per call) ------------------------------------------------------
    #   u = (v @ Wv^T) @ Wu^T == v @ (Wv^T @ Wu^T)  -> fuse V and U into one (F, 2F) weight.
    wvut = jnp.dot(Wv.T, Wu.T, precision=jax.lax.Precision.HIGHEST)
    wvu = jnp.concatenate([Wv.T, wvut], axis=1).astype(weights_dtype)   # (F, 2F)
    w1t = W1.T.astype(weights_dtype)                                    # (2F, F): rows [vnorm; s]
    b1r = b1.reshape(1, f).astype(jnp.float32)
    w2t = W2.T.astype(weights_dtype)                                    # (F, 3F): heads fused
    b2r = b2.reshape(1, 3 * f).astype(jnp.float32)

    const = lambda i: (0, 0)
    outv, outs = pl.pallas_call(
        update_kernel,
        out_shape=(jax.ShapeDtypeStruct((n, 3 * f), v.dtype),
                   jax.ShapeDtypeStruct((n, f), s.dtype)),
        grid_spec=pltpu.PrefetchScalarGridSpec(
            num_scalar_prefetch=0,
            grid=(grid_n,),
            in_specs=[
                pl.BlockSpec((tile_n, 3 * f), lambda i: (i, 0)),   # v, components in lane slabs
                pl.BlockSpec((tile_n, f), lambda i: (i, 0)),       # s
                pl.BlockSpec((f, 2 * f), const),                   # [Wv^T | Wv^T Wu^T]
                pl.BlockSpec((2 * f, f), const),                   # W1^T (K=2F fused)
                pl.BlockSpec((1, f), const),                       # b1
                pl.BlockSpec((f, 3 * f), const),                   # W2^T (3 heads fused)
                pl.BlockSpec((1, 3 * f), const),                   # b2
            ],
            out_specs=[
                pl.BlockSpec((tile_n, 3 * f), lambda i: (i, 0)),   # out_v (lane slabs per component)
                pl.BlockSpec((tile_n, f), lambda i: (i, 0)),       # out_s
            ],
        ),
        compiler_params=pltpu.CompilerParams(
            dimension_semantics=("parallel",),
            vmem_limit_bytes=vmem_limit),
    )(v2d, s2d, wvu, w1t, b1r, w2t, b2r)

    out_v = outv.reshape(n, 3, f)
    out_s = outs.reshape(n, 1, f)
    return out_v, out_s


def update_reference(s, v, params):
    """Pure-JAX reference mirroring the PyTorch forward exactly."""
    Wv, Wu, W1, b1, W2, b2 = params
    f = Wv.shape[0]
    v = jnp.einsum('ncf,of->nco', v, Wv)                      # V(v)
    u = jnp.einsum('ncf,of->nco', v, Wu)                      # U(v)
    vnorm = jnp.linalg.norm(v, axis=1, keepdims=True)         # (N, 1, f)
    s_stack = jnp.concatenate([vnorm, s], axis=2)             # (N, 1, 2f)
    h = jnp.einsum('nif,of->nio', s_stack, W1) + b1
    h = h * jax.nn.sigmoid(h)                                 # SiLU
    split = jnp.einsum('nif,of->nio', h, W2) + b2             # (N, 1, 3f)
    a_vv, a_sv, a_ss = split[:, :, :f], split[:, :, f:2 * f], split[:, :, 2 * f:]
    out_v = u * a_vv
    s_new = jnp.sum(u * v, axis=1)[:, None, :]
    out_s = s_new * a_sv + a_ss
    return out_v, out_s


if __name__ == "__main__":
    key = jax.random.PRNGKey(0)
    kp, ks, kv = jax.random.split(key, 3)
    params = make_params(kp)

    n_atoms = 200  # deliberately not a tile multiple -> exercises the ragged last grid block
    s_in = jax.random.normal(ks, (n_atoms, 1, F), jnp.float32)
    v_in = jax.random.normal(kv, (n_atoms, 3, F), jnp.float32)

    ref_v, ref_s = update_reference(s_in, v_in, params)

    # f32-weight path: tight parity with the f32 PyTorch-equivalent reference.
    f32_fn = jax.jit(functools.partial(update_pallas, weights_dtype=jnp.float32))
    out_v, out_s = f32_fn(s_in, v_in, params)
    out_v = jax.block_until_ready(out_v)
    out_s = jax.block_until_ready(out_s)
    np.testing.assert_allclose(np.asarray(out_v), np.asarray(ref_v), rtol=3e-5, atol=3e-5)
    np.testing.assert_allclose(np.asarray(out_s), np.asarray(ref_s), rtol=3e-5, atol=3e-5)

    # Default fast path (bf16 weights/operands, f32 accumulation): looser tolerance vs f32 reference.
    fast_fn = jax.jit(update_pallas)
    out_v, out_s = fast_fn(s_in, v_in, params)
    out_v = jax.block_until_ready(out_v)
    out_s = jax.block_until_ready(out_s)
    np.testing.assert_allclose(np.asarray(out_v), np.asarray(ref_v), rtol=6e-2, atol=6e-2)
    np.testing.assert_allclose(np.asarray(out_s), np.asarray(ref_s), rtol=6e-2, atol=6e-2)

    print("KERNEL_OK")
</pallas_src>

<mosaic_0001>
module attributes {stable_mosaic.version = 11 : i64} {
  func.func @update_kernel(%arg0: i32, %arg1: memref<104x384xf32, #tpu.memory_space<vmem>>, %arg2: memref<104x128xf32, #tpu.memory_space<vmem>>, %arg3: memref<128x256xf32, #tpu.memory_space<vmem>>, %arg4: memref<256x128xf32, #tpu.memory_space<vmem>>, %arg5: memref<1x128xf32, #tpu.memory_space<vmem>>, %arg6: memref<128x384xf32, #tpu.memory_space<vmem>>, %arg7: memref<1x384xf32, #tpu.memory_space<vmem>>, %arg8: memref<104x384xf32, #tpu.memory_space<vmem>>, %arg9: memref<104x128xf32, #tpu.memory_space<vmem>>) attributes {dimension_semantics = [#tpu.dimension_semantics<parallel>], iteration_bounds = array<i64: 2>, scalar_prefetch = 0 : i64, scratch_operands = 0 : i64, tpu.core_type = #tpu.core_type<tc>, window_params = [{transform_indices = @transform_0, window_bounds = array<i64: 104, 384>}, {transform_indices = @transform_1, window_bounds = array<i64: 104, 128>}, {pipeline_mode = #tpu.pipeline_mode<synchronous>, transform_indices = @transform_2, window_bounds = array<i64: 128, 256>}, {pipeline_mode = #tpu.pipeline_mode<synchronous>, transform_indices = @transform_3, window_bounds = array<i64: 256, 128>}, {pipeline_mode = #tpu.pipeline_mode<synchronous>, transform_indices = @transform_4, window_bounds = array<i64: 1, 128>}, {pipeline_mode = #tpu.pipeline_mode<synchronous>, transform_indices = @transform_5, window_bounds = array<i64: 128, 384>}, {pipeline_mode = #tpu.pipeline_mode<synchronous>, transform_indices = @transform_6, window_bounds = array<i64: 1, 384>}, {transform_indices = @transform_7, window_bounds = array<i64: 104, 384>}, {transform_indices = @transform_8, window_bounds = array<i64: 104, 128>}]} {
    %c0 = arith.constant 0 : index
    %c0_0 = arith.constant 0 : index
    %0 = vector.load %arg1[%c0, %c0_0] : memref<104x384xf32, #tpu.memory_space<vmem>>, vector<104x128xf32>
    %c0_1 = arith.constant 0 : index
    %c0_2 = arith.constant 0 : index
    %1 = vector.load %arg3[%c0_1, %c0_2] : memref<128x256xf32, #tpu.memory_space<vmem>>, vector<128x256xf32>
    %cst = arith.constant dense<0.000000e+00> : vector<104x256xf32>
    %2 = tpu.matmul %0, %1, %cst {dimension_numbers = #tpu.dot_dimension_numbers<[1], [0], [0], [1], [0, 0, 1, 1], [], []>} : vector<104x128xf32>, vector<128x256xf32>, vector<104x256xf32> -> vector<104x256xf32>
    %3 = vector.extract_strided_slice %2 {offsets = [0, 0], sizes = [104, 128], strides = [1, 1]} : vector<104x256xf32> to vector<104x128xf32>
    %4 = vector.extract_strided_slice %2 {offsets = [0, 128], sizes = [104, 128], strides = [1, 1]} : vector<104x256xf32> to vector<104x128xf32>
    %c0_3 = arith.constant 0 : index
    %c0_4 = arith.constant 0 : index
    %5 = vector.load %arg8[%c0_3, %c0_4] : memref<104x384xf32, #tpu.memory_space<vmem>>, vector<104x128xf32>
    tpu.vector_store %arg8[%c0_3, %c0_4], %4 {strides = array<i32>} : memref<104x384xf32, #tpu.memory_space<vmem>>, vector<104x128xf32>,
    %6 = arith.mulf %3, %3 : vector<104x128xf32>
    %7 = arith.mulf %4, %3 : vector<104x128xf32>
    %c0_5 = arith.constant 0 : index
    %c128 = arith.constant 128 : index
    %8 = vector.load %arg1[%c0_5, %c128] : memref<104x384xf32, #tpu.memory_space<vmem>>, vector<104x128xf32>
    %c0_6 = arith.constant 0 : index
    %c0_7 = arith.constant 0 : index
    %9 = vector.load %arg3[%c0_6, %c0_7] : memref<128x256xf32, #tpu.memory_space<vmem>>, vector<128x256xf32>
    %cst_8 = arith.constant dense<0.000000e+00> : vector<104x256xf32>
    %10 = tpu.matmul %8, %9, %cst_8 {dimension_numbers = #tpu.dot_dimension_numbers<[1], [0], [0], [1], [0, 0, 1, 1], [], []>} : vector<104x128xf32>, vector<128x256xf32>, vector<104x256xf32> -> vector<104x256xf32>
    %11 = vector.extract_strided_slice %10 {offsets = [0, 0], sizes = [104, 128], strides = [1, 1]} : vector<104x256xf32> to vector<104x128xf32>
    %12 = vector.extract_strided_slice %10 {offsets = [0, 128], sizes = [104, 128], strides = [1, 1]} : vector<104x256xf32> to vector<104x128xf32>
    %c0_9 = arith.constant 0 : index
    %c128_10 = arith.constant 128 : index
    %13 = vector.load %arg8[%c0_9, %c128_10] : memref<104x384xf32, #tpu.memory_space<vmem>>, vector<104x128xf32>
    tpu.vector_store %arg8[%c0_9, %c128_10], %12 {strides = array<i32>} : memref<104x384xf32, #tpu.memory_space<vmem>>, vector<104x128xf32>,
    %14 = arith.mulf %11, %11 : vector<104x128xf32>
    %15 = arith.addf %6, %14 : vector<104x128xf32>
    %16 = arith.mulf %12, %11 : vector<104x128xf32>
    %17 = arith.addf %7, %16 : vector<104x128xf32>
    %c0_11 = arith.constant 0 : index
    %c256 = arith.constant 256 : index
    %18 = vector.load %arg1[%c0_11, %c256] : memref<104x384xf32, #tpu.memory_space<vmem>>, vector<104x128xf32>
    %c0_12 = arith.constant 0 : index
    %c0_13 = arith.constant 0 : index
    %19 = vector.load %arg3[%c0_12, %c0_13] : memref<128x256xf32, #tpu.memory_space<vmem>>, vector<128x256xf32>
    %cst_14 = arith.constant dense<0.000000e+00> : vector<104x256xf32>
    %20 = tpu.matmul %18, %19, %cst_14 {dimension_numbers = #tpu.dot_dimension_numbers<[1], [0], [0], [1], [0, 0, 1, 1], [], []>} : vector<104x128xf32>, vector<128x256xf32>, vector<104x256xf32> -> vector<104x256xf32>
    %21 = vector.extract_strided_slice %20 {offsets = [0, 0], sizes = [104, 128], strides = [1, 1]} : vector<104x256xf32> to vector<104x128xf32>
    %22 = vector.extract_strided_slice %20 {offsets = [0, 128], sizes = [104, 128], strides = [1, 1]} : vector<104x256xf32> to vector<104x128xf32>
    %c0_15 = arith.constant 0 : index
    %c256_16 = arith.constant 256 : index
    %23 = vector.load %arg8[%c0_15, %c256_16] : memref<104x384xf32, #tpu.memory_space<vmem>>, vector<104x128xf32>
    tpu.vector_store %arg8[%c0_15, %c256_16], %22 {strides = array<i32>} : memref<104x384xf32, #tpu.memory_space<vmem>>, vector<104x128xf32>,
    %24 = arith.mulf %21, %21 : vector<104x128xf32>
    %25 = arith.addf %15, %24 : vector<104x128xf32>
    %26 = arith.mulf %22, %21 : vector<104x128xf32>
    %27 = arith.addf %17, %26 : vector<104x128xf32>
    %28 = math.sqrt %25 : vector<104x128xf32>
    %c0_17 = arith.constant 0 : index
    %c0_18 = arith.constant 0 : index
    %29 = vector.load %arg2[%c0_17, %c0_18] : memref<104x128xf32, #tpu.memory_space<vmem>>, vector<104x128xf32>
    %30 = tpu.concatenate %28, %29 in 1 : vector<104x128xf32>, vector<104x128xf32> -> vector<104x256xf32>
    %c0_19 = arith.constant 0 : index
    %c0_20 = arith.constant 0 : index
    %31 = vector.load %arg4[%c0_19, %c0_20] : memref<256x128xf32, #tpu.memory_space<vmem>>, vector<256x128xf32>
    %cst_21 = arith.constant dense<0.000000e+00> : vector<104x128xf32>
    %32 = tpu.matmul %30, %31, %cst_21 {dimension_numbers = #tpu.dot_dimension_numbers<[1], [0], [0], [1], [0, 0, 1, 1], [], []>} : vector<104x256xf32>, vector<256x128xf32>, vector<104x128xf32> -> vector<104x128xf32>
    %c0_22 = arith.constant 0 : index
    %c0_23 = arith.constant 0 : index
    %33 = vector.load %arg5[%c0_22, %c0_23] : memref<1x128xf32, #tpu.memory_space<vmem>>, vector<1x128xf32>
    %34 = vector.broadcast %33 : vector<1x128xf32> to vector<104x128xf32>
    %35 = arith.addf %32, %34 : vector<104x128xf32>
    %36 = arith.negf %35 : vector<104x128xf32>
    %37 = math.exp %36 : vector<104x128xf32>
    %cst_24 = arith.constant 1.000000e+00 : f32
    %38 = vector.broadcast %cst_24 : f32 to vector<104x128xf32>
    %39 = arith.addf %38, %37 : vector<104x128xf32>
    %40 = arith.divf %38, %39 : vector<104x128xf32>
    %41 = arith.mulf %35, %40 : vector<104x128xf32>
    %c0_25 = arith.constant 0 : index
    %c0_26 = arith.constant 0 : index
    %42 = vector.load %arg6[%c0_25, %c0_26] : memref<128x384xf32, #tpu.memory_space<vmem>>, vector<128x384xf32>
    %cst_27 = arith.constant dense<0.000000e+00> : vector<104x384xf32>
    %43 = tpu.matmul %41, %42, %cst_27 {dimension_numbers = #tpu.dot_dimension_numbers<[1], [0], [0], [1], [0, 0, 1, 1], [], []>} : vector<104x128xf32>, vector<128x384xf32>, vector<104x384xf32> -> vector<104x384xf32>
    %c0_28 = arith.constant 0 : index
    %c0_29 = arith.constant 0 : index
    %44 = vector.load %arg7[%c0_28, %c0_29] : memref<1x384xf32, #tpu.memory_space<vmem>>, vector<1x384xf32>
    %45 = vector.broadcast %44 : vector<1x384xf32> to vector<104x384xf32>
    %46 = arith.addf %43, %45 : vector<104x384xf32>
    %47 = vector.extract_strided_slice %46 {offsets = [0, 0], sizes = [104, 128], strides = [1, 1]} : vector<104x384xf32> to vector<104x128xf32>
    %48 = vector.extract_strided_slice %46 {offsets = [0, 128], sizes = [104, 128], strides = [1, 1]} : vector<104x384xf32> to vector<104x128xf32>
    %49 = vector.extract_strided_slice %46 {offsets = [0, 256], sizes = [104, 128], strides = [1, 1]} : vector<104x384xf32> to vector<104x128xf32>
    %c0_30 = arith.constant 0 : index
    %c0_31 = arith.constant 0 : index
    %50 = vector.load %arg8[%c0_30, %c0_31] : memref<104x384xf32, #tpu.memory_space<vmem>>, vector<104x128xf32>
    %51 = arith.mulf %50, %47 : vector<104x128xf32>
    %c0_32 = arith.constant 0 : index
    %c0_33 = arith.constant 0 : index
    %52 = vector.load %arg8[%c0_32, %c0_33] : memref<104x384xf32, #tpu.memory_space<vmem>>, vector<104x128xf32>
    tpu.vector_store %arg8[%c0_32, %c0_33], %51 {strides = array<i32>} : memref<104x384xf32, #tpu.memory_space<vmem>>, vector<104x128xf32>,
    %c0_34 = arith.constant 0 : index
    %c128_35 = arith.constant 128 : index
    %53 = vector.load %arg8[%c0_34, %c128_35] : memref<104x384xf32, #tpu.memory_space<vmem>>, vector<104x128xf32>
    %54 = arith.mulf %53, %47 : vector<104x128xf32>
    %c0_36 = arith.constant 0 : index
    %c128_37 = arith.constant 128 : index
    %55 = vector.load %arg8[%c0_36, %c128_37] : memref<104x384xf32, #tpu.memory_space<vmem>>, vector<104x128xf32>
    tpu.vector_store %arg8[%c0_36, %c128_37], %54 {strides = array<i32>} : memref<104x384xf32, #tpu.memory_space<vmem>>, vector<104x128xf32>,
    %c0_38 = arith.constant 0 : index
    %c256_39 = arith.constant 256 : index
    %56 = vector.load %arg8[%c0_38, %c256_39] : memref<104x384xf32, #tpu.memory_space<vmem>>, vector<104x128xf32>
    %57 = arith.mulf %56, %47 : vector<104x128xf32>
    %c0_40 = arith.constant 0 : index
    %c256_41 = arith.constant 256 : index
    %58 = vector.load %arg8[%c0_40, %c256_41] : memref<104x384xf32, #tpu.memory_space<vmem>>, vector<104x128xf32>
    tpu.vector_store %arg8[%c0_40, %c256_41], %57 {strides = array<i32>} : memref<104x384xf32, #tpu.memory_space<vmem>>, vector<104x128xf32>,
    %59 = arith.mulf %27, %48 : vector<104x128xf32>
    %60 = arith.addf %59, %49 : vector<104x128xf32>
    %c0_42 = arith.constant 0 : index
    %c0_43 = arith.constant 0 : index
    %61 = vector.load %arg9[%c0_42, %c0_43] : memref<104x128xf32, #tpu.memory_space<vmem>>, vector<104x128xf32>
    tpu.vector_store %arg9[%c0_42, %c0_43], %60 {strides = array<i32>} : memref<104x128xf32, #tpu.memory_space<vmem>>, vector<104x128xf32>,
    return
  }
  func.func @transform_0(%arg0: i32) -> (i32, i32) {
    %c0_i32 = arith.constant 0 : i32
    %c0_i32_0 = arith.constant 0 : i32
    return %arg0, %c0_i32 : i32, i32
  }
  func.func @transform_1(%arg0: i32) -> (i32, i32) {
    %c0_i32 = arith.constant 0 : i32
    %c0_i32_0 = arith.constant 0 : i32
    return %arg0, %c0_i32 : i32, i32
  }
  func.func @transform_2(%arg0: i32) -> (i32, i32) {
    %c0_i32 = arith.constant 0 : i32
    %c0_i32_0 = arith.constant 0 : i32
    %c0_i32_1 = arith.constant 0 : i32
    return %c0_i32, %c0_i32_0 : i32, i32
  }
  func.func @transform_3(%arg0: i32) -> (i32, i32) {
    %c0_i32 = arith.constant 0 : i32
    %c0_i32_0 = arith.constant 0 : i32
    %c0_i32_1 = arith.constant 0 : i32
    return %c0_i32, %c0_i32_0 : i32, i32
  }
  func.func @transform_4(%arg0: i32) -> (i32, i32) {
    %c0_i32 = arith.constant 0 : i32
    %c0_i32_0 = arith.constant 0 : i32
    %c0_i32_1 = arith.constant 0 : i32
    return %c0_i32, %c0_i32_0 : i32, i32
  }
  func.func @transform_5(%arg0: i32) -> (i32, i32) {
    %c0_i32 = arith.constant 0 : i32
    %c0_i32_0 = arith.constant 0 : i32
    %c0_i32_1 = arith.constant 0 : i32
    return %c0_i32, %c0_i32_0 : i32, i32
  }
  func.func @transform_6(%arg0: i32) -> (i32, i32) {
    %c0_i32 = arith.constant 0 : i32
    %c0_i32_0 = arith.constant 0 : i32
    %c0_i32_1 = arith.constant 0 : i32
    return %c0_i32, %c0_i32_0 : i32, i32
  }
  func.func @transform_7(%arg0: i32) -> (i32, i32) {
    %c0_i32 = arith.constant 0 : i32
    %c0_i32_0 = arith.constant 0 : i32
    return %arg0, %c0_i32 : i32, i32
  }
  func.func @transform_8(%arg0: i32) -> (i32, i32) {
    %c0_i32 = arith.constant 0 : i32
    %c0_i32_0 = arith.constant 0 : i32
    return %arg0, %c0_i32 : i32, i32
  }
}

</mosaic_0001>

<bundles_post_ra>
// kernel: update_pallas.1
= control target key start
LH: loop header
LB: loop body
LE: loop exit
PB: predicated region body
PF: predicated region fallthrough
CT: control target
= control target key end

     0   :  { %s4519_s0 = inlined_call_operand.vmem [shape: f32[200,384], index: 0, kind: input, shape index: {}]   ;;  %s4520_s1 = inlined_call_operand.vmem [shape: f32[200,128], index: 1, kind: input, shape index: {}]   ;;  %s4521_s2 = inlined_call_operand.vmem [shape: f32[128,256], index: 2, kind: input, shape index: {}]   ;;  %s4522_s3 = inlined_call_operand.vmem [shape: f32[256,128], index: 3, kind: input, shape index: {}]   ;;  %s4523_s4 = inlined_call_operand.vmem [shape: f32[1,128], index: 4, kind: input, shape index: {}]   ;;  %s4524_s5 = inlined_call_operand.vmem [shape: f32[128,384], index: 5, kind: input, shape index: {}]   ;;  %s4525_s6 = inlined_call_operand.vmem [shape: f32[1,384], index: 6, kind: input, shape index: {}]   ;;  %s4526_s7 = inlined_call_operand.vmem [shape: f32[200,384], index: 7, kind: output, shape index: {0}]   ;;  %s4527_s8 = inlined_call_operand.hbm [shape: f32[200,128], index: 8, kind: output, shape index: {1}]  }
   0x1   :  { %4532 = sst [smem:[#allocation10_spill]] %s4519_s0 }
   0x2   :  { %4533 = sst [smem:[#allocation11_spill]] %s4520_s1 }
   0x3   :  { %4534 = sst [smem:[#allocation12_spill]] %s4521_s2 }
   0x4   :  { %4535 = sst [smem:[#allocation13_spill]] %s4522_s3 }
   0x5   :  { %14 = vsyncpa [#allocation4], 0 }
   0x6   :  { %16 = vsyncpa [#allocation4 + $0x1], 0  ;;  %s2773_s27 = smov 0   ;;  %s2775_s28 = smov 0  }
   0x7   :  { %s2777_s29 = smov 0   ;;  %s2779_s30 = smov 0  }
   0x8 LB: > { %s2794_s9 = sadd.s32 4294967295, %s2691_s30   ;;  %s2290_s10 = sadd.s32 4294967294, %s2691_s30   ;;  %s2691_s30 = sphi %s2779_s30, %s4561_s30   ;;  %s2687_s29 = sphi %s2777_s29, %s4560_s29   ;;  %s2683_s28 = sphi %s2775_s28, %s4559_s28   ;;  %s2679_s27 = sphi %s2773_s27, %s4558_s27  }
   0x9   : > { %s2798_s11 = sadd.s32 1, %s2691_s30   ;;  %s186_s12 = sadd.s32 1, %s2687_s29 }
   0xa   : > { %s183_s13 = ssub.s32 %s2691_s30, %s2798_s11  ;;  %p196_p0 = scmp.ne.s32.totalorder %s2687_s29, %s2683_s28 }
   0xb   : > { %p184_p1 = scmp.eq.s32.totalorder %s183_s13, 0  ;;  %p197_p2 = scmp.eq.s32.totalorder %s2794_s9, 1 }
   0xc   : > { %p228_p3 = scmp.ne.s32.totalorder %s2683_s28, %s2679_s27  ;;  %p229_p4 = scmp.eq.s32.totalorder %s2290_s10, 1 }
   0xd   : > { %s2809_s14 = scalar_select %p184_p1, %s2687_s29, %s186_s12  }
   0xe   : > { %p2811_p5 = por %p197_p2, %p196_p0  ;;  %p2815_p6 = por %p229_p4, %p228_p3 }
   0xf   : > { %p2293_p7 = scmp.ge.s32.totalorder %s2691_s30, 1  ;;  %p299_p8 = scmp.lt.s32.totalorder %s2691_s30, 3 }
  0x11   : > { %p300_p9 = pnand %p2293_p7, %p299_p8 }
  0x13   : > { %303 = sbr.rel (%p300_p9) target bundleno = 798 (0x31e), region = 48 }
  0x18   : > { %s4538_s2 = sld [smem:[#allocation12_spill]]  ;;  %s2914_s19 = smul.u32 13, %s2794_s9 }
  0x19   : > { %s4539_s0 = sld [smem:[#allocation10_spill]]  ;;  %s3305_s18 = sand.u32 1, %s2683_s28  }
  0x1a   : > { %p358_p10 = scmp.lt.s32.totalorder %s2914_s19, 24  ;;  %s4540_s3 = sld [smem:[#allocation13_spill]] }
  0x1b   : > { %s2390_s10 = smul.u32 312, %s3305_s18  ;;  %s4543_s1 = sld [smem:[#allocation11_spill]] }
  0x1c   : > { %s2974_s24 = scalar_select %p358_p10, %s2914_s19, 24 }
  0x1d   : > { %s2391_s17 = smul.u32 104, %s3305_s18  ;;  %s2004_s23 = ssub.s32 (%p2811_p5), 25, %s2914_s19 }
  0x1e   : > { %v2824_v0 = vld [vmem:[%s4538_s2 + $0xf0] sm:$0xff]  ;;  %v2829_v1 = vld [vmem:[%s4538_s2 + $0xf8] sm:$0xff]  ;;  %v2834_v2 = vld [vmem:[%s4538_s2 + $0xe0] sm:$0xff]  ;;  %s2392_s21 = smul.u32 24, %s2974_s24  ;;  %s2295_s26 = sshll.u32 %s2974_s24, 3 }
  0x1f   : > { %439 = vmatpush.msra.mxu0 %v2824_v0  ;;  %2326 = vmatpush.msra.mxu3 %v2824_v0  ;;  %v2841_v3 = vld [vmem:[%s4538_s2 + $0xe8] sm:$0xff]  ;;  %v2848_v4 = vld [vmem:[%s4538_s2 + $0xd0] sm:$0xff]  ;;  %v2855_v5 = vld [vmem:[%s4538_s2 + $0xd8] sm:$0xff]  ;;  %s4198_s20 = scalar_lea.vmem [#allocation3], %s2391_s17  ;;  %s2399_s25 = smul.u32 (%p2811_p5), 312, %s2794_s9 }
  0x20   : > { %495 = vmatpush.msra.mxu1 %v2829_v1  ;;  %635 = vmatpush.msra.mxu2 %v2824_v0  ;;  %v2862_v6 = vld [vmem:[%s4538_s2 + $0xc0] sm:$0xff]  ;;  %v2869_v7 = vld [vmem:[%s4538_s2 + $0xc8] sm:$0xff]  ;;  %v2876_v8 = vld [vmem:[%s4538_s2 + $0xb0] sm:$0xff]  ;;  %s3036_s22 = scalar_lea.vmem %s4539_s0, %s2392_s21  ;;  %s3324_s21 = scalar_lea.vmem [#allocation2], %s2390_s10  }
  0x21   : > { %440 = vmatpush.msra.mxu0 %v2834_v2  ;;  %2327 = vmatpush.msra.mxu3 %v2834_v2  ;;  %v2883_v9 = vld [vmem:[%s4538_s2 + $0xb8] sm:$0xff]  ;;  %v2890_v10 = vld [vmem:[%s4538_s2 + $0xa0] sm:$0xff]  ;;  %v2897_v11 = vld [vmem:[%s4538_s2 + $0xa8] sm:$0xff]  ;;  %s3433_s13 = scalar_lea.vmem %s4543_s1, %s2295_s26  ;;  %p2005_p11 = scmp.lt.s32.totalorder (%p2811_p5), %s2004_s23, 13 }
  0x22   : > { %496 = vmatpush.msra.mxu1 %v2841_v3  ;;  %636 = vmatpush.msra.mxu2 %v2834_v2  ;;  %v2904_v12 = vld [vmem:[%s4538_s2 + $0x90] sm:$0xff]  ;;  %v2911_v13 = vld [vmem:[%s4538_s2 + $0x98] sm:$0xff]  ;;  %v2921_v14 = vld [vmem:[%s4538_s2 + $0x80] sm:$0xff]  ;;  %s4323_s12 = scalar_lea.vmem (%p2811_p5), %s4526_s7, %s2399_s25  }
  0x23   : > { %441 = vmatpush.msra.mxu0 %v2848_v4  ;;  %2328 = vmatpush.msra.mxu3 %v2848_v4  ;;  %v2928_v15 = vld [vmem:[%s4538_s2 + $0x88] sm:$0xff]  ;;  %v2935_v16 = vld [vmem:[%s4538_s2 + $0x70] sm:$0xff]  ;;  %v2942_v17 = vld [vmem:[%s4538_s2 + $0x78] sm:$0xff] }
  0x24   : > { %497 = vmatpush.msra.mxu1 %v2855_v5  ;;  %637 = vmatpush.msra.mxu2 %v2848_v4  ;;  %v2950_v18 = vld [vmem:[%s4538_s2 + $0x60] sm:$0xff]  ;;  %v2957_v19 = vld [vmem:[%s4538_s2 + $0x68] sm:$0xff]  ;;  %v2964_v20 = vld [vmem:[%s4538_s2 + $0x50] sm:$0xff] }
  0x25   : > { %442 = vmatpush.msra.mxu0 %v2862_v6  ;;  %2329 = vmatpush.msra.mxu3 %v2862_v6  ;;  %v2971_v21 = vld [vmem:[%s4538_s2 + $0x58] sm:$0xff]  ;;  %v2981_v22 = vld [vmem:[%s4538_s2 + $0x40] sm:$0xff]  ;;  %v2988_v23 = vld [vmem:[%s4538_s2 + $0x48] sm:$0xff] }
  0x26   : > { %498 = vmatpush.msra.mxu1 %v2869_v7  ;;  %638 = vmatpush.msra.mxu2 %v2862_v6  ;;  %v2995_v24 = vld [vmem:[%s4538_s2 + $0x30] sm:$0xff]  ;;  %v3002_v25 = vld [vmem:[%s4538_s2 + $0x38] sm:$0xff]  ;;  %v3010_v26 = vld [vmem:[%s4538_s2 + $0x20] sm:$0xff] }
  0x27   : > { %443 = vmatpush.msra.mxu0 %v2876_v8  ;;  %2330 = vmatpush.msra.mxu3 %v2876_v8  ;;  %v3017_v27 = vld [vmem:[%s4538_s2 + $0x28] sm:$0xff]  ;;  %v3024_v28 = vld [vmem:[%s4538_s2 + $0x10] sm:$0xff]  ;;  %v3031_v29 = vld [vmem:[%s4538_s2 + $0x18] sm:$0xff] }
  0x28   : > { %499 = vmatpush.msra.mxu1 %v2883_v9  ;;  %639 = vmatpush.msra.mxu2 %v2876_v8  ;;  %v3043_v30 = vld [vmem:[%s4538_s2] sm:$0xff]  ;;  %v3050_v31 = vld [vmem:[%s4538_s2 + $0x8] sm:$0xff]  ;;  %v3073_v35 = vld [vmem:[%s3036_s22 + $0x78] sm:$0xff] }
  0x29   : > { %444 = vmatpush.msra.mxu0 %v2890_v10  ;;  %2331 = vmatpush.msra.mxu3 %v2890_v10  ;;  %v394_v32 = vld [vmem:[%s3036_s22] sm:$0xff]  ;;  %v3061_v34 = vld [vmem:[%s3036_s22 + $0x8] sm:$0xff]  ;;  %v395_v36 = vld [vmem:[%s3036_s22 + $0x18] sm:$0xff] }
  0x2a   : > { %500 = vmatpush.msra.mxu1 %v2897_v11  ;;  %640 = vmatpush.msra.mxu2 %v2890_v10  ;;  %v3056_v33 = vld [vmem:[%s3036_s22 + $0x60] sm:$0xff]  ;;  %v3091_v38 = vld [vmem:[%s3036_s22 + $0x90] sm:$0xff]  ;;  %v3098_v40 = vld [vmem:[%s3036_s22 + $0x38] sm:$0xff] }
  0x2b   : > { %445 = vmatpush.msra.mxu0 %v2904_v12  ;;  %2332 = vmatpush.msra.mxu3 %v2904_v12  ;;  %v3080_v37 = vld [vmem:[%s3036_s22 + $0x20] sm:$0xff]  ;;  %v396_v39 = vld [vmem:[%s3036_s22 + $0x30] sm:$0xff]  ;;  %v401_v41 = vld [vmem:[%s3036_s22 + $0xa8] sm:$0xff] }
  0x2c   : > { %501 = vmatpush.msra.mxu1 %v2911_v13  ;;  %641 = vmatpush.msra.mxu2 %v2904_v12  ;;  %v397_v42 = vld [vmem:[%s3036_s22 + $0x48] sm:$0xff]  ;;  %v3115_v43 = vld [vmem:[%s3036_s22 + $0x50] sm:$0xff]  ;;  %v402_v44 = vld [vmem:[%s3036_s22 + $0xc0] sm:$0xff] }
  0x2d   : > { %446 = vmatpush.msra.mxu0 %v2921_v14  ;;  %2333 = vmatpush.msra.mxu3 %v2921_v14  ;;  %v3130_v45 = vld [vmem:[%s3036_s22 + $0x10] sm:$0xff]  ;;  %v3133_v46 = vld [vmem:[%s3036_s22 + $0x68] sm:$0xff]  ;;  %v403_v47 = vld [vmem:[%s3036_s22 + $0xd8] sm:$0xff] }
  0x2e   : > { %502 = vmatpush.msra.mxu1 %v2928_v15  ;;  %642 = vmatpush.msra.mxu2 %v2921_v14  ;;  %v3147_v48 = vld [vmem:[%s3036_s22 + $0x28] sm:$0xff]  ;;  %v3151_v49 = vld [vmem:[%s3036_s22 + $0x80] sm:$0xff]  ;;  %v1218_v50 = vld [vmem:[%s4540_s3 + $0x78] sm:$0xff] }
  0x2f   : > { %447 = vmatpush.msra.mxu0 %v2935_v16  ;;  %2334 = vmatpush.msra.mxu3 %v2935_v16  ;;  %v404_v51 = vld [vmem:[%s3036_s22 + $0xf0] sm:$0xff]  ;;  %v3164_v52 = vld [vmem:[%s3036_s22 + $0x40] sm:$0xff]  ;;  %v3167_v53 = vld [vmem:[%s3036_s22 + $0x98] sm:$0xff] }
  0x30   : > { %503 = vmatpush.msra.mxu1 %v2942_v17  ;;  %643 = vmatpush.msra.mxu2 %v2935_v16  ;;  %v1234_v54 = vld [vmem:[%s4540_s3 + $0xf8] sm:$0xff]  ;;  %v1217_v55 = vld [vmem:[%s4540_s3 + $0x70] sm:$0xff]  ;;  %v405_v56 = vld [vmem:[%s3036_s22 + $0x108] sm:$0xff] }
  0x31   : > { %448 = vmatpush.msra.mxu0 %v2950_v18  ;;  %2335 = vmatpush.msra.mxu3 %v2950_v18  ;;  %v3180_v57 = vld [vmem:[%s3036_s22 + $0x58] sm:$0xff]  ;;  %v3183_v58 = vld [vmem:[%s3036_s22 + $0xb0] sm:$0xff]  ;;  %v1216_v60 = vld [vmem:[%s4540_s3 + $0x68] sm:$0xff] }
  0x32   : > { %504 = vmatpush.msra.mxu1 %v2957_v19  ;;  %644 = vmatpush.msra.mxu2 %v2950_v18  ;;  %v1233_v59 = vld [vmem:[%s4540_s3 + $0xf0] sm:$0xff]  ;;  %v1232_v61 = vld [vmem:[%s4540_s3 + $0xe8] sm:$0xff]  ;;  %v406_v62 = vld [vmem:[%s3036_s22 + $0x120] sm:$0xff] }
  0x33   : > { %449 = vmatpush.msra.mxu0 %v2964_v20  ;;  %2336 = vmatpush.msra.mxu3 %v2964_v20  ;;  %v3198_v63 = vld [vmem:[%s3036_s22 + $0x70] sm:$0xff] }
  0x34   : > { %505 = vmatpush.msra.mxu1 %v2971_v21  ;;  %645 = vmatpush.msra.mxu2 %v2964_v20 }
  0x35   : > { %450 = vmatpush.msra.mxu0 %v2981_v22  ;;  %2337 = vmatpush.msra.mxu3 %v2981_v22 }
  0x36   : > { %506 = vmatpush.msra.mxu1 %v2988_v23  ;;  %646 = vmatpush.msra.mxu2 %v2981_v22 }
  0x37   : > { %451 = vmatpush.msra.mxu0 %v2995_v24  ;;  %2338 = vmatpush.msra.mxu3 %v2995_v24 }
  0x38   : > { %507 = vmatpush.msra.mxu1 %v3002_v25  ;;  %647 = vmatpush.msra.mxu2 %v2995_v24 }
  0x39   : > { %452 = vmatpush.msra.mxu0 %v3010_v26  ;;  %2339 = vmatpush.msra.mxu3 %v3010_v26 }
  0x3a   : > { %508 = vmatpush.msra.mxu1 %v3017_v27  ;;  %648 = vmatpush.msra.mxu2 %v3010_v26 }
  0x3b   : > { %453 = vmatpush.msra.mxu0 %v3024_v28  ;;  %2340 = vmatpush.msra.mxu3 %v3024_v28 }
  0x3c   : > { %509 = vmatpush.msra.mxu1 %v3031_v29  ;;  %649 = vmatpush.msra.mxu2 %v3024_v28 }
  0x3d   : > { %454 = vmatpush.msra.mxu0 %v3043_v30  ;;  %2341 = vmatpush.msra.mxu3 %v3043_v30 }
  0x3e   : > { %510 = vmatpush.msra.mxu1 %v3050_v31  ;;  %650 = vmatpush.msra.mxu2 %v3043_v30 }
  0x3f   : > { %455 = vmatmul.f32.vlgmr.msra.gmra.mxu0 %v394_v32  ;;  %467 = vmatmul.f32.vlgmr.msra.gmra.mxu3 %v3056_v33 }
  0x40   : > { %511 = vmatmul.f32.vlgmr.msra.gmra.mxu1 %v394_v32  ;;  %651 = vmatmul.f32.vlgmr.msra.gmra.mxu2 %v3061_v34  ;;  %v3322_v32 = vld [vmem:[%s3036_s22 + $0x130] sm:$0xff] }
  0x41   : > { %857 = vmatpush.msrb.mxu0 %v2824_v0  ;;  %691 = vmatpush.msrb.mxu3 %v2829_v1  ;;  %v3201_v0 = vld [vmem:[%s3036_s22 + $0xc8] sm:$0xff] }
  0x42   : > { %913 = vmatpush.msrb.mxu1 %v2829_v1  ;;  %1239 = vmatpush.msrb.mxu2 %v1218_v50  ;;  %v1215_v1 = vld [vmem:[%s4540_s3 + $0x60] sm:$0xff] }
  0x43   : > { %858 = vmatpush.msrb.mxu0 %v2834_v2  ;;  %692 = vmatpush.msrb.mxu3 %v2841_v3  ;;  %v1231_v2 = vld [vmem:[%s4540_s3 + $0xe0] sm:$0xff] }
  0x44   : > { %914 = vmatpush.msrb.mxu1 %v2841_v3  ;;  %1240 = vmatpush.msrb.mxu2 %v1217_v55  ;;  %v3212_v3 = vld [vmem:[%s3036_s22 + $0x88] sm:$0xff] }
  0x45   : > { %859 = vmatpush.msrb.mxu0 %v2848_v4  ;;  %693 = vmatpush.msrb.mxu3 %v2855_v5  ;;  %v3215_v4 = vld [vmem:[%s3036_s22 + $0xe0] sm:$0xff] }
  0x46   : > { %915 = vmatpush.msrb.mxu1 %v2855_v5  ;;  %1241 = vmatpush.msrb.mxu2 %v1216_v60  ;;  %v1214_v5 = vld [vmem:[%s4540_s3 + $0x58] sm:$0xff] }
  0x47   : > { %860 = vmatpush.msrb.mxu0 %v2862_v6  ;;  %470 = vmatmul.f32.gmra.mxu3 %v3073_v35  ;;  %v1230_v6 = vld [vmem:[%s4540_s3 + $0xd8] sm:$0xff] }
  0x48   : > { %458 = vmatmul.f32.gmra.mxu0 %v395_v36  ;;  %514 = vmatmul.f32.gmra.mxu1 %v395_v36 }
  0x49   : > { %654 = vmatmul.f32.gmra.mxu2 %v3080_v37  ;;  %861 = vmatpush.msrb.mxu0 %v2876_v8  ;;  %v3230_v8 = vld [vmem:[%s3036_s22 + $0xf8] sm:$0xff] }
  0x4a   : > { %694 = vmatpush.msrb.mxu3 %v2869_v7  ;;  %916 = vmatpush.msrb.mxu1 %v2869_v7  ;;  %v3227_v7 = vld [vmem:[%s3036_s22 + $0xa0] sm:$0xff] }
  0x4b   : > { %862 = vmatpush.msrb.mxu0 %v2890_v10  ;;  %1242 = vmatpush.msrb.mxu2 %v1215_v1  ;;  %v1229_v10 = vld [vmem:[%s4540_s3 + $0xd0] sm:$0xff] }
  0x4c   : > { %695 = vmatpush.msrb.mxu3 %v2883_v9  ;;  %917 = vmatpush.msrb.mxu1 %v2883_v9  ;;  %v1213_v9 = vld [vmem:[%s4540_s3 + $0x50] sm:$0xff] }
  0x4d   : > { %863 = vmatpush.msrb.mxu0 %v2904_v12  ;;  %1243 = vmatpush.msrb.mxu2 %v1214_v5  ;;  %v3245_v12 = vld [vmem:[%s3036_s22 + $0xb8] sm:$0xff] }
  0x4e   : > { %696 = vmatpush.msrb.mxu3 %v2897_v11  ;;  %918 = vmatpush.msrb.mxu1 %v2897_v11  ;;  %v1212_v11 = vld [vmem:[%s4540_s3 + $0x48] sm:$0xff] }
  0x4f   : > { %864 = vmatpush.msrb.mxu0 %v2921_v14  ;;  %473 = vmatmul.f32.gmra.mxu3 %v3091_v38  ;;  %v1228_v14 = vld [vmem:[%s4540_s3 + $0xc8] sm:$0xff] }
  0x50   : > { %461 = vmatmul.f32.gmra.mxu0 %v396_v39  ;;  %517 = vmatmul.f32.gmra.mxu1 %v396_v39  ;;  %v1205_v39 = vld [vmem:[%s4540_s3 + $0x10] sm:$0xff] }
  0x51   : > { %657 = vmatmul.f32.gmra.mxu2 %v3098_v40  ;;  %865 = vmatpush.msrb.mxu0 %v2935_v16  ;;  %v3260_v16 = vld [vmem:[%s3036_s22 + $0x128] sm:$0xff] }
  0x52   : > { %697 = vmatpush.msrb.mxu3 %v2911_v13  ;;  %919 = vmatpush.msrb.mxu1 %v2911_v13  ;;  %v3248_v13 = vld [vmem:[%s3036_s22 + $0x110] sm:$0xff] }
  0x53   : > { %866 = vmatpush.msrb.mxu0 %v2950_v18  ;;  %1244 = vmatpush.msrb.mxu2 %v1213_v9  ;;  %v1227_v18 = vld [vmem:[%s4540_s3 + $0xc0] sm:$0xff] }
  0x54   : > { %698 = vmatpush.msrb.mxu3 %v2928_v15  ;;  %920 = vmatpush.msrb.mxu1 %v2928_v15  ;;  %v3257_v15 = vld [vmem:[%s3036_s22 + $0xd0] sm:$0xff] }
  0x55   : > { %867 = vmatpush.msrb.mxu0 %v2964_v20  ;;  %1245 = vmatpush.msrb.mxu2 %v1212_v11  ;;  %v1210_v20 = vld [vmem:[%s4540_s3 + $0x38] sm:$0xff] }
  0x56   : > { %699 = vmatpush.msrb.mxu3 %v2942_v17  ;;  %921 = vmatpush.msrb.mxu1 %v2942_v17  ;;  %v1211_v17 = vld [vmem:[%s4540_s3 + $0x40] sm:$0xff] }
  0x57   : > { %868 = vmatpush.msrb.mxu0 %v2981_v22  ;;  %476 = vmatmul.f32.gmra.mxu3 %v401_v41  ;;  %v1209_v22 = vld [vmem:[%s4540_s3 + $0x30] sm:$0xff] }
  0x58   : > { %464 = vmatmul.f32.gmra.mxu0 %v397_v42  ;;  %520 = vmatmul.f32.gmra.mxu1 %v397_v42 }
  0x59   : > { %660 = vmatmul.f32.gmra.mxu2 %v3115_v43  ;;  %869 = vmatpush.msrb.mxu0 %v2995_v24  ;;  %v1225_v24 = vld [vmem:[%s4540_s3 + $0xb0] sm:$0xff] }
  0x5a   : > { %700 = vmatpush.msrb.mxu3 %v2957_v19  ;;  %922 = vmatpush.msrb.mxu1 %v2957_v19  ;;  %v3272_v19 = vld [vmem:[%s3036_s22 + $0xe8] sm:$0xff] }
  0x5b   : > { %870 = vmatpush.msrb.mxu0 %v3010_v26  ;;  %1246 = vmatpush.msrb.mxu2 %v1211_v17  ;;  %v1224_v26 = vld [vmem:[%s4540_s3 + $0xa8] sm:$0xff] }
  0x5c   : > { %701 = vmatpush.msrb.mxu3 %v2971_v21  ;;  %923 = vmatpush.msrb.mxu1 %v2971_v21  ;;  %v1226_v21 = vld [vmem:[%s4540_s3 + $0xb8] sm:$0xff] }
  0x5d   : > { %871 = vmatpush.msrb.mxu0 %v3024_v28  ;;  %1247 = vmatpush.msrb.mxu2 %v1210_v20  ;;  %v1207_v28 = vld [vmem:[%s4540_s3 + $0x20] sm:$0xff] }
  0x5e   : > { %702 = vmatpush.msrb.mxu3 %v2988_v23  ;;  %924 = vmatpush.msrb.mxu1 %v2988_v23  ;;  %v3287_v23 = vld [vmem:[%s3036_s22 + $0x100] sm:$0xff] }
  0x5f   : > { %872 = vmatpush.msrb.mxu0 %v3043_v30  ;;  %479 = vmatmul.f32.gmra.mxu3 %v402_v44 }
  0x60   : > { %523 = vmatmul.f32.gmra.mxu1 %v3056_v33  ;;  %873 = vmatmul.f32.vlgmr.msrb.gmra.mxu0 %v3130_v45  ;;  %v1206_v33 = vld [vmem:[%s4540_s3 + $0x18] sm:$0xff] }
  0x61   : > { %663 = vmatmul.f32.gmra.mxu2 %v3133_v46  ;;  %703 = vmatpush.msrb.mxu3 %v3002_v25 }
  0x62   : > { %925 = vmatpush.msrb.mxu1 %v3002_v25  ;;  %1248 = vmatpush.msrb.mxu2 %v1209_v22  ;;  %v1208_v25 = vld [vmem:[%s4540_s3 + $0x28] sm:$0xff] }
  0x63   : > { %704 = vmatpush.msrb.mxu3 %v3017_v27 }
  0x64   : > { %926 = vmatpush.msrb.mxu1 %v3017_v27  ;;  %1249 = vmatpush.msrb.mxu2 %v1208_v25  ;;  %v3302_v27 = vld [vmem:[%s3036_s22 + $0x118] sm:$0xff] }
  0x65   : > { %705 = vmatpush.msrb.mxu3 %v3031_v29 }
  0x66   : > { %927 = vmatpush.msrb.mxu1 %v3031_v29  ;;  %v1223_v29 = vld [vmem:[%s4540_s3 + $0xa0] sm:$0xff]  ;;  %1250 = vmatpush.msrb.mxu2 %v1207_v28 }
  0x67   : > { %482 = vmatmul.f32.gmra.mxu3 %v403_v47 }
  0x68   : > { %526 = vmatmul.f32.gmra.mxu1 %v3073_v35  ;;  %876 = vmatmul.f32.gmra.mxu0 %v3147_v48 }
  0x69   : > { %666 = vmatmul.f32.gmra.mxu2 %v3151_v49  ;;  %706 = vmatpush.msrb.mxu3 %v3050_v31 }
  0x6a   : > { %928 = vmatpush.msrb.mxu1 %v3050_v31  ;;  %1251 = vmatpush.msrb.mxu2 %v1206_v33 }
  0x6b   : > { %1295 = vmatpush.msra.mxu3 %v1234_v54 }
  0x6c   : > { %1252 = vmatpush.msrb.mxu2 %v1205_v39 }
  0x6d   : > { %1296 = vmatpush.msra.mxu3 %v1233_v59 }
  0x6f   : > { %485 = vmatmul.f32.gmra.mxu3 %v404_v51 }
  0x70   : > { %529 = vmatmul.f32.gmra.mxu1 %v3091_v38  ;;  %879 = vmatmul.f32.gmra.mxu0 %v3164_v52 }
  0x71   : > { %669 = vmatmul.f32.gmra.mxu2 %v3167_v53  ;;  %1297 = vmatpush.msra.mxu3 %v1232_v61 }
  0x73   : > { %1298 = vmatpush.msra.mxu3 %v1231_v2 }
  0x75   : > { %1299 = vmatpush.msra.mxu3 %v1230_v6 }
  0x77   : > { %488 = vmatmul.f32.gmra.mxu3 %v405_v56 }
  0x78   : > { %532 = vmatmul.f32.gmra.mxu1 %v401_v41  ;;  %882 = vmatmul.f32.gmra.mxu0 %v3180_v57  ;;  %v1204_v41 = vld [vmem:[%s4540_s3 + $0x8] sm:$0xff] }
  0x79   : > { %672 = vmatmul.f32.gmra.mxu2 %v3183_v58  ;;  %1300 = vmatpush.msra.mxu3 %v1229_v10 }
  0x7a   : > { %1253 = vmatpush.msrb.mxu2 %v1204_v41  ;;  %v1191_v41 = vld [vmem:[%s3433_s13 + $0x8] sm:$0xff] }
  0x7b   : > { %1301 = vmatpush.msra.mxu3 %v1228_v14 }
  0x7d   : > { %1302 = vmatpush.msra.mxu3 %v1227_v18 }
  0x7f   : > { %491 = vmatmul.f32.gmra.mxu3 %v406_v62 }
  0x80   : > { %535 = vmatmul.f32.gmra.mxu1 %v402_v44  ;;  %885 = vmatmul.f32.gmra.mxu0 %v3198_v63 }
  0x81   : > { %675 = vmatmul.f32.gmra.mxu2 %v3201_v0  ;;  %1303 = vmatpush.msra.mxu3 %v1226_v21 }
  0x83   : > { %1304 = vmatpush.msra.mxu3 %v1225_v24 }
  0x85   : > { %1305 = vmatpush.msra.mxu3 %v1224_v26 }
  0x87   : > { %707 = vmatmul.f32.vlgmr.msrb.gmra.mxu3 %v3061_v34  ;;  %v1222_v34 = vld [vmem:[%s4540_s3 + $0x98] sm:$0xff] }
  0x88   : > { %538 = vmatmul.f32.gmra.mxu1 %v403_v47  ;;  %888 = vmatmul.f32.gmra.mxu0 %v3212_v3  ;;  %v1203_v47 = vld [vmem:[%s4540_s3] sm:$0xff] }
  0x89   : > { %678 = vmatmul.f32.gmra.mxu2 %v3215_v4  ;;  %1306 = vmatpush.msra.mxu3 %v1223_v29 }
  0x8a   : > { %1254 = vmatpush.msrb.mxu2 %v1203_v47 }
  0x8b   : > { %1307 = vmatpush.msra.mxu3 %v1222_v34 }
  0x8f   : > { %710 = vmatmul.f32.gmra.mxu3 %v3080_v37 }
  0x90   : > { %541 = vmatmul.f32.gmra.mxu1 %v404_v51  ;;  %891 = vmatmul.f32.gmra.mxu0 %v3227_v7 }
  0x91   : > { %681 = vmatmul.f32.gmra.mxu2 %v3230_v8 }
  0x97   : > { %713 = vmatmul.f32.gmra.mxu3 %v3098_v40  ;;  %v1221_v40 = vld [vmem:[%s4540_s3 + $0x90] sm:$0xff] }
  0x98   : > { %544 = vmatmul.f32.gmra.mxu1 %v405_v56  ;;  %894 = vmatmul.f32.gmra.mxu0 %v3245_v12 }
  0x99   : > { %684 = vmatmul.f32.gmra.mxu2 %v3248_v13  ;;  %1308 = vmatpush.msra.mxu3 %v1221_v40 }
  0x9f   : > { %716 = vmatmul.f32.gmra.mxu3 %v3115_v43 }
  0xa0   : > { %547 = vmatmul.f32.gmra.mxu1 %v406_v62  ;;  %897 = vmatmul.f32.gmra.mxu0 %v3257_v15 }
  0xa1   : > { %687 = vmatmul.f32.gmra.mxu2 %v3260_v16 }
  0xa7   : > { %719 = vmatmul.f32.gmra.mxu3 %v3133_v46  ;;  %v1220_v46 = vld [vmem:[%s4540_s3 + $0x88] sm:$0xff] }
  0xa8   : > { %900 = vmatmul.f32.gmra.mxu0 %v3272_v19  ;;  %929 = vmatmul.f32.vlgmr.msrb.gmra.mxu1 %v3130_v45 }
  0xa9   : > { %1309 = vmatpush.msra.mxu3 %v1220_v46 }
  0xaf   : > { %722 = vmatmul.f32.gmra.mxu3 %v3151_v49 }
  0xb0   : > { %903 = vmatmul.f32.gmra.mxu0 %v3287_v23  ;;  %932 = vmatmul.f32.gmra.mxu1 %v3147_v48 }
  0xb7   : > { %725 = vmatmul.f32.gmra.mxu3 %v3167_v53 }
  0xb8   : > { %906 = vmatmul.f32.gmra.mxu0 %v3302_v27  ;;  %935 = vmatmul.f32.gmra.mxu1 %v3164_v52  ;;  %v1219_v52 = vld [vmem:[%s4540_s3 + $0x80] sm:$0xff] }
  0xb9   : > { %1310 = vmatpush.msra.mxu3 %v1219_v52 }
  0xbc   : > { %v3317_v30 = vpop.f32.mrf.mxu0 }
  0xbd   : > { %v3319_v31 = vpop.f32.mrf.mxu1  ;;  %v564_v55 = vmul.f32 %v3317_v30, %v3317_v30 }
  0xbe   : > { %551 = vst [vmem:[%s3324_s21] sm:$0xff] %v3319_v31 }
  0xbf   : > { %728 = vmatmul.f32.gmra.mxu3 %v3183_v58 }
  0xc0   : > { %909 = vmatmul.f32.gmra.mxu0 %v3322_v32  ;;  %938 = vmatmul.f32.gmra.mxu1 %v3180_v57 }
  0xc2   : > { %v3337_v35 = vpop.f32.mrf.mxu3 }
  0xc3   : > { %v3339_v36 = vpop.f32.mrf.mxu2 }
  0xc4   : > { %v760_v53 = vmul.f32 %v3339_v36, %v3339_v36 }
  0xc5   : > { %v3341_v37 = vpop.f32.mrf.mxu0  ;;  %v3343_v38 = vpop.f32.mrf.mxu1 }
  0xc6   : > { %552 = vst [vmem:[%s3324_s21 + $0x18] sm:$0xff] %v3343_v38  ;;  %v773_v59 = vadd.f32 %v760_v53, %v564_v55 }
  0xc7   : > { %731 = vmatmul.f32.gmra.mxu3 %v3201_v0  ;;  %v565_v0 = vmul.f32 %v3341_v37, %v3341_v37 }
  0xc8   : > { %941 = vmatmul.f32.gmra.mxu1 %v3198_v63 }
  0xca   : > { %v3358_v42 = vpop.f32.mrf.mxu3 }
  0xcc   : > { %v3360_v43 = vpop.f32.mrf.mxu2 }
  0xcd   : > { %v3362_v44 = vpop.f32.mrf.mxu0  ;;  %v3364_v45 = vpop.f32.mrf.mxu1  ;;  %v761_v62 = vmul.f32 %v3360_v43, %v3360_v43 }
  0xce   : > { %4541 = vst [vmem:[#allocation6_spill] sm:$0xff] %v3362_v44 }
  0xcf   : > { %4542 = vst [vmem:[#allocation7_spill] sm:$0xff] %v3364_v45  ;;  %734 = vmatmul.f32.gmra.mxu3 %v3215_v4  ;;  %v774_v4 = vadd.f32 %v761_v62, %v565_v0 }
  0xd0   : > { %553 = vst [vmem:[%s3324_s21 + $0x30] sm:$0xff] %v3364_v45  ;;  %944 = vmatmul.f32.gmra.mxu1 %v3212_v3 }
  0xd2   : > { %v3376_v48 = vpop.f32.mrf.mxu3 }
  0xd4   : > { %v3378_v49 = vpop.f32.mrf.mxu2 }
  0xd5   : > { %v3380_v50 = vpop.f32.mrf.mxu0  ;;  %v3382_v51 = vpop.f32.mrf.mxu1  ;;  %v762_v9 = vmul.f32 %v3378_v49, %v3378_v49 }
  0xd6   : > { %554 = vst [vmem:[%s3324_s21 + $0x48] sm:$0xff] %v3382_v51  ;;  %v567_v39 = vmul.f32 %v3380_v50, %v3380_v50 }
  0xd7   : > { %737 = vmatmul.f32.gmra.mxu3 %v3230_v8 }
  0xd8   : > { %947 = vmatmul.f32.gmra.mxu1 %v3227_v7 }
  0xda   : > { %v3393_v54 = vpop.f32.mrf.mxu3 }
  0xdc   : > { %v3397_v56 = vpop.f32.mrf.mxu2 }
  0xdd   : > { %v3399_v57 = vpop.f32.mrf.mxu1  ;;  %v3401_v58 = vpop.f32.mrf.mxu0  ;;  %v763_v28 = vmul.f32 %v3397_v56, %v3397_v56 }
  0xde   : > { %555 = vst [vmem:[%s3324_s21 + $0x60] sm:$0xff] %v3399_v57  ;;  %v982_v60 = vmul.f32 %v3401_v58, %v3401_v58 }
  0xdf   : > { %740 = vmatmul.f32.gmra.mxu3 %v3248_v13  ;;  %v1190_v13 = vld [vmem:[%s3433_s13] sm:$0xff]  ;;  %v776_v53 = vadd.f32 %v763_v28, %v567_v39 }
  0xe0   : > { %v995_v61 = vadd.f32 %v982_v60, %v773_v59  ;;  %950 = vmatmul.f32.gmra.mxu1 %v3245_v12  ;;  %v566_v12 = vmul.f32 %v3362_v44, %v3362_v44 }
  0xe2   : > { %v3411_v63 = vpop.f32.mrf.mxu3  ;;  %2501 = vrsqrt.f32 %v995_v61  ;;  %v775_v17 = vadd.f32 %v762_v9, %v566_v12  ;;  %vm1041_vm0 = vcmp.eq.f32.partialorder %v995_v61, inf  ;;  %v1044_v40 = vand.u32 2147483648, %v995_v61 }
  0xe3   : > { %vm1043_vm1 = vcmp.eq.f32.partialorder %v995_v61, 0.0  ;;  %v568_v12 = vmul.f32 %v3337_v35, %v3337_v35 }
  0xe4   : > { %v3415_v1 = vpop.f32.mrf.mxu2 }
  0xe5   : > { %v3417_v2 = vpop.f32.mrf.mxu1  ;;  %v3419_v3 = vpop.f32.mrf.mxu0 }
  0xe6   : > { %556 = vst [vmem:[%s3324_s21 + $0x78] sm:$0xff] %v3417_v2  ;;  %v983_v5 = vmul.f32 %v3419_v3, %v3419_v3 }
  0xe7   : > { %743 = vmatmul.f32.gmra.mxu3 %v3260_v16 }
  0xe8   : > { %v2502_v6 = vpop.eup %2501  ;;  %v3427_v7 = vadd.f32 %v983_v5, %v774_v4  ;;  %953 = vmatmul.f32.gmra.mxu1 %v3257_v15 }
  0xe9   : > { %v1035_v8 = vmul.f32 %v2502_v6, %v995_v61 }
  0xea   : > { %v3437_v10 = vpop.f32.mrf.mxu3  ;;  %2503 = vrsqrt.f32 %v3427_v7  ;;  %vm1053_vm2 = vcmp.eq.f32.partialorder %v3427_v7, inf  ;;  %vm1055_vm3 = vcmp.eq.f32.partialorder %v3427_v7, 0.0 }
  0xeb   : > { %v1036_v11 = vmul.f32 %v2502_v6, %v1035_v8 }
  0xec   : > { %v3447_v18 = vpop.f32.mrf.mxu2 }
  0xed   : > { %v3443_v14 = vpop.f32.mrf.mxu1  ;;  %v3445_v15 = vpop.f32.mrf.mxu0  ;;  %v1037_v16 = vmul.f32 0.5, %v1036_v11 }
  0xee   : > { %4544 = vst [vmem:[#allocation8_spill] sm:$0xff] %v3445_v15  ;;  %v984_v20 = vmul.f32 %v3445_v15, %v3445_v15 }
  0xef   : > { %557 = vst [vmem:[%s3324_s21 + $0x90] sm:$0xff] %v3443_v14  ;;  %v1038_v21 = vsub.f32 1.5, %v1037_v16  ;;  %1311 = vmatmul.f32.vlgmr.msra.gmra.mxu3 %v1190_v13  ;;  %v1192_v13 = vld [vmem:[%s3433_s13 + $0x10] sm:$0xff] }
  0xf0   : > { %v2504_v22 = vpop.eup %2503  ;;  %v3453_v24 = vadd.f32 %v984_v20, %v775_v17  ;;  %956 = vmatmul.f32.gmra.mxu1 %v3272_v19 }
  0xf1   : > { %v1039_v25 = vmul.f32 %v2502_v6, %v1038_v21  ;;  %v1047_v26 = vmul.f32 %v2504_v22, %v3427_v7  ;;  %v764_v6 = vmul.f32 %v3415_v1, %v3415_v1 }
  0xf2   : > { %v3459_v29 = vpop.f32.mrf.mxu3  ;;  %2505 = vrsqrt.f32 %v3453_v24  ;;  %vm1065_vm4 = vcmp.eq.f32.partialorder %v3453_v24, inf  ;;  %vm1067_vm5 = vcmp.eq.f32.partialorder %v3453_v24, 0.0 }
  0xf3   : > { %v1040_v33 = vmul.f32 %v1039_v25, %v995_v61  ;;  %v1048_v34 = vmul.f32 %v2504_v22, %v1047_v26 }
  0xf4   : > { %v3473_v0 = vpop.f32.mrf.mxu2 }
  0xf5   : > { %v3465_v19 = vpop.f32.mrf.mxu1  ;;  %v3467_v46 = vpop.f32.mrf.mxu0  ;;  %v1042_v47 = vsel %vm1041_vm0, %v995_v61, %v1040_v33  ;;  %v1049_v52 = vmul.f32 0.5, %v1048_v34 }
  0xf6   : > { %558 = vst [vmem:[%s3324_s21 + $0xa8] sm:$0xff] %v3465_v19  ;;  %v985_v55 = vmul.f32 %v3467_v46, %v3467_v46  ;;  %v1045_v59 = vsel %vm1043_vm1, %v1044_v40, %v1042_v47  ;;  %v765_v40 = vmul.f32 %v3447_v18, %v3447_v18 }
  0xf7   : > { %1255 = vmatmul.f32.vlgmr.msrb.gmra.mxu2 %v1045_v59  ;;  %v1050_v60 = vsub.f32 1.5, %v1049_v52  ;;  %1314 = vmatmul.f32.gmra.mxu3 %v1191_v41  ;;  %v1193_v59 = vld [vmem:[%s3433_s13 + $0x18] sm:$0xff] }
  0xf8   : > { %v2506_v62 = vpop.eup %2505  ;;  %v3475_v4 = vadd.f32 %v985_v55, %v776_v53  ;;  %959 = vmatmul.f32.gmra.mxu1 %v3287_v23  ;;  %v1056_v23 = vand.u32 2147483648, %v3427_v7  ;;  %v569_v55 = vmul.f32 %v3358_v42, %v3358_v42 }
  0xf9   : > { %v1051_v61 = vmul.f32 %v2504_v22, %v1050_v60  ;;  %v1059_v5 = vmul.f32 %v2506_v62, %v3453_v24  ;;  %v777_v22 = vadd.f32 %v764_v6, %v568_v12 }
  0xfa   : > { %v3481_v8 = vpop.f32.mrf.mxu3  ;;  %2507 = vrsqrt.f32 %v3475_v4  ;;  %v778_v6 = vadd.f32 %v765_v40, %v569_v55  ;;  %vm1077_vm6 = vcmp.eq.f32.partialorder %v3475_v4, inf  ;;  %vm1079_vm7 = vcmp.eq.f32.partialorder %v3475_v4, 0.0 }
  0xfb   : > { %v1052_v9 = vmul.f32 %v1051_v61, %v3427_v7  ;;  %v1060_v11 = vmul.f32 %v2506_v62, %v1059_v5 }
  0xfc   : > { %v3506_v41 = vpop.f32.mrf.mxu2 }
  0xfd   : > { %v3490_v16 = vpop.f32.mrf.mxu1  ;;  %v3492_v17 = vpop.f32.mrf.mxu0  ;;  %v1054_v20 = vsel %vm1053_vm2, %v3427_v7, %v1052_v9  ;;  %v1061_v21 = vmul.f32 0.5, %v1060_v11 }
  0xfe   : > { %559 = vst [vmem:[%s3324_s21 + $0xc0] sm:$0xff] %v3490_v16  ;;  %v986_v25 = vmul.f32 %v3492_v17, %v3492_v17  ;;  %v1057_v26 = vsel %vm1055_vm3, %v1056_v23, %v1054_v20 }
  0xff   : > { %1258 = vmatmul.f32.gmra.mxu2 %v1057_v26  ;;  %v1062_v28 = vsub.f32 1.5, %v1061_v21  ;;  %1317 = vmatmul.f32.gmra.mxu3 %v1192_v13  ;;  %v766_v21 = vmul.f32 %v3473_v0, %v3473_v0 }
 0x100   : > { %v2508_v33 = vpop.eup %2507  ;;  %v3500_v34 = vadd.f32 %v986_v25, %v777_v22  ;;  %962 = vmatmul.f32.gmra.mxu1 %v3302_v27  ;;  %v1068_v27 = vand.u32 2147483648, %v3453_v24 }
 0x101   : > { %v1063_v39 = vmul.f32 %v2506_v62, %v1062_v28  ;;  %v1071_v7 = vmul.f32 %v2508_v33, %v3475_v4  ;;  %v570_v28 = vmul.f32 %v3376_v48, %v3376_v48 }
 0x102   : > { %v3508_v47 = vpop.f32.mrf.mxu3  ;;  %2509 = vrsqrt.f32 %v3500_v34  ;;  %vm1089_vm8 = vcmp.eq.f32.partialorder %v3500_v34, inf  ;;  %vm1091_vm9 = vcmp.eq.f32.partialorder %v3500_v34, 0.0 }
 0x103   : > { %v1064_v52 = vmul.f32 %v1063_v39, %v3453_v24  ;;  %v1072_v53 = vmul.f32 %v2508_v33, %v1071_v7  ;;  %v1194_v39 = vld [vmem:[%s3433_s13 + $0x20] sm:$0xff]  ;;  %v779_v55 = vadd.f32 %v766_v21, %v570_v28  ;;  %v571_v21 = vmul.f32 %v3393_v54, %v3393_v54 }
 0x105   : > { %v3517_v60 = vpop.f32.mrf.mxu1  ;;  %v3519_v62 = vpop.f32.mrf.mxu0  ;;  %v1066_v61 = vsel %vm1065_vm4, %v3453_v24, %v1064_v52  ;;  %v1073_v5 = vmul.f32 0.5, %v1072_v53 }
 0x106   : > { %560 = vst [vmem:[%s3324_s21 + $0xd8] sm:$0xff] %v3517_v60  ;;  %v987_v9 = vmul.f32 %v3519_v62, %v3519_v62  ;;  %v1069_v11 = vsel %vm1067_vm5, %v1068_v27, %v1066_v61 }
 0x107   : > { %1261 = vmatmul.f32.gmra.mxu2 %v1069_v11  ;;  %v1074_v12 = vsub.f32 1.5, %v1073_v5  ;;  %1320 = vmatmul.f32.gmra.mxu3 %v1193_v59 }
 0x108   : > { %v2510_v23 = vpop.eup %2509  ;;  %v3527_v13 = vadd.f32 %v987_v9, %v778_v6  ;;  %965 = vmatmul.f32.gmra.mxu1 %v3322_v32  ;;  %v3541_v32 = vpop.f32.mrf.mxu2 }
 0x109   : > { %v1075_v20 = vmul.f32 %v2508_v33, %v1074_v12  ;;  %v1083_v24 = vmul.f32 %v2510_v23, %v3500_v34  ;;  %v1080_v33 = vand.u32 2147483648, %v3475_v4 }
 0x10a   : > { %v3533_v22 = vpop.f32.mrf.mxu3  ;;  %2511 = vrsqrt.f32 %v3527_v13  ;;  %vm1101_vm10 = vcmp.eq.f32.partialorder %v3527_v13, inf  ;;  %vm1103_vm11 = vcmp.eq.f32.partialorder %v3527_v13, 0.0 }
 0x10b   : > { %747 = vst [vmem:[%s3324_s21 + $0x8] sm:$0xff] %v3533_v22  ;;  %v1076_v25 = vmul.f32 %v1075_v20, %v3475_v4  ;;  %v1084_v26 = vmul.f32 %v2510_v23, %v1083_v24  ;;  %v786_v15 = vmul.f32 %v3533_v22, %v3339_v36 }
 0x10d   : > { %v3546_v7 = vpop.f32.mrf.mxu1  ;;  %v3548_v40 = vpop.f32.mrf.mxu0  ;;  %v1078_v52 = vsel %vm1077_vm6, %v3475_v4, %v1076_v25  ;;  %v1085_v53 = vmul.f32 0.5, %v1084_v26  ;;  %v767_v4 = vmul.f32 %v3506_v41, %v3506_v41  ;;  %v1195_v25 = vld [vmem:[%s3433_s13 + $0x28] sm:$0xff] }
 0x10e   : > { %561 = vst [vmem:[%s3324_s21 + $0xf0] sm:$0xff] %v3546_v7  ;;  %v988_v27 = vmul.f32 %v3548_v40, %v3548_v40  ;;  %v1081_v59 = vsel %vm1079_vm7, %v1080_v33, %v1078_v52 }
 0x10f   : > { %1264 = vmatmul.f32.gmra.mxu2 %v1081_v59  ;;  %v1086_v61 = vsub.f32 1.5, %v1085_v53  ;;  %1323 = vmatmul.f32.gmra.mxu3 %v1194_v39  ;;  %v780_v52 = vadd.f32 %v767_v4, %v571_v21  ;;  %v572_v21 = vmul.f32 %v3411_v63, %v3411_v63 }
 0x110   : > { %v2512_v5 = vpop.eup %2511  ;;  %v3556_v6 = vadd.f32 %v988_v27, %v779_v55  ;;  %v3578_v53 = vpop.f32.mrf.mxu2 }
 0x111   : > { %v1087_v9 = vmul.f32 %v2510_v23, %v1086_v61  ;;  %v1095_v11 = vmul.f32 %v2512_v5, %v3527_v13  ;;  %v1092_v23 = vand.u32 2147483648, %v3500_v34 }
 0x112   : > { %v3561_v12 = vpop.f32.mrf.mxu3  ;;  %2513 = vrsqrt.f32 %v3556_v6  ;;  %vm1113_vm12 = vcmp.eq.f32.partialorder %v3556_v6, inf  ;;  %vm1115_vm13 = vcmp.eq.f32.partialorder %v3556_v6, 0.0 }
 0x113   : > { %748 = vst [vmem:[%s3324_s21 + $0x20] sm:$0xff] %v3561_v12  ;;  %v1088_v20 = vmul.f32 %v1087_v9, %v3500_v34  ;;  %v1096_v24 = vmul.f32 %v2512_v5, %v1095_v11  ;;  %v768_v11 = vmul.f32 %v3541_v32, %v3541_v32 }
 0x115   : > { %v3572_v26 = vpop.f32.mrf.mxu1  ;;  %v3574_v28 = vpop.f32.mrf.mxu0  ;;  %v1090_v33 = vsel %vm1089_vm8, %v3500_v34, %v1088_v20  ;;  %v1097_v39 = vmul.f32 0.5, %v1096_v24  ;;  %v1656_v34 = vld [vmem:[%s4524_s5 + $0x168] sm:$0xff] }
 0x116   : > { %562 = vst [vmem:[%s3324_s21 + $0x108] sm:$0xff] %v3572_v26  ;;  %v989_v55 = vmul.f32 %v3574_v28, %v3574_v28  ;;  %v1093_v27 = vsel %vm1091_vm9, %v1092_v23, %v1090_v33  ;;  %1667 = vmatpush.msra.mxu0 %v1656_v34  ;;  %2342 = vmatpush.msrb.mxu3 %v1656_v34  ;;  %v1196_v33 = vld [vmem:[%s3433_s13 + $0x30] sm:$0xff] }
 0x117   : > { %1267 = vmatmul.f32.gmra.mxu2 %v1093_v27  ;;  %v1098_v59 = vsub.f32 1.5, %v1097_v39  ;;  %1326 = vmatmul.f32.gmra.mxu3 %v1195_v25  ;;  %v781_v39 = vadd.f32 %v768_v11, %v572_v21  ;;  %v1653_v34 = vld [vmem:[%s4524_s5 + $0x150] sm:$0xff] }
 0x118   : > { %v2514_v61 = vpop.eup %2513  ;;  %v3584_v9 = vadd.f32 %v989_v55, %v780_v52  ;;  %1668 = vmatpush.msra.mxu0 %v1653_v34  ;;  %2343 = vmatpush.msrb.mxu3 %v1653_v34  ;;  %v1116_v34 = vand.u32 2147483648, %v3556_v6 }
 0x119   : > { %v1099_v4 = vmul.f32 %v2512_v5, %v1098_v59  ;;  %v1107_v20 = vmul.f32 %v2514_v61, %v3556_v6  ;;  %v1104_v5 = vand.u32 2147483648, %v3527_v13 }
 0x11a   : > { %v3592_v24 = vpop.f32.mrf.mxu3  ;;  %2515 = vrsqrt.f32 %v3584_v9  ;;  %vm1125_vm14 = vcmp.eq.f32.partialorder %v3584_v9, inf  ;;  %vm1127_vm15 = vcmp.eq.f32.partialorder %v3584_v9, 0.0 }
 0x11b   : > { %4545 = vst [vmem:[#allocation9_spill] sm:$0xff] %v3592_v24  ;;  %v1100_v23 = vmul.f32 %v1099_v4, %v3527_v13  ;;  %v1108_v25 = vmul.f32 %v2514_v61, %v1107_v20 }
 0x11c   : > { %749 = vst [vmem:[%s3324_s21 + $0x38] sm:$0xff] %v3592_v24 }
 0x11d   : > { %v548_v52 = vpop.f32.mrf.mxu1  ;;  %v3603_v55 = vpop.f32.mrf.mxu0  ;;  %v1102_v27 = vsel %vm1101_vm10, %v3527_v13, %v1100_v23  ;;  %v1109_v59 = vmul.f32 0.5, %v1108_v25 }
 0x11e   : > { %563 = vst [vmem:[%s3324_s21 + $0x120] sm:$0xff] %v548_v52  ;;  %v3612_v4 = vmul.f32 %v548_v52, %v3508_v47  ;;  %v990_v20 = vmul.f32 %v3603_v55, %v3603_v55  ;;  %v1105_v11 = vsel %vm1103_vm11, %v1104_v5, %v1102_v27  ;;  %v3616_v23 = vpop.f32.mrf.mxu2  ;;  %v1650_v52 = vld [vmem:[%s4524_s5 + $0x138] sm:$0xff] }
 0x11f   : > { %1270 = vmatmul.f32.gmra.mxu2 %v1105_v11  ;;  %v1110_v21 = vsub.f32 1.5, %v1109_v59  ;;  %1329 = vmatmul.f32.gmra.mxu3 %v1196_v33  ;;  %v769_v33 = vmul.f32 %v3578_v53, %v3578_v53 }
 0x120   : > { %v2516_v13 = vpop.eup %2515  ;;  %v3618_v25 = vadd.f32 %v990_v20, %v781_v39  ;;  %1669 = vmatpush.msra.mxu0 %v1650_v52  ;;  %2344 = vmatpush.msrb.mxu3 %v1650_v52  ;;  %v577_v39 = vmul.f32 %v3319_v31, %v3317_v30  ;;  %v1197_v20 = vld [vmem:[%s3433_s13 + $0x38] sm:$0xff] }
 0x121   : > { %v1111_v5 = vmul.f32 %v2514_v61, %v1110_v21  ;;  %v1119_v27 = vmul.f32 %v2516_v13, %v3584_v9  ;;  %v573_v61 = vmul.f32 %v3437_v10, %v3437_v10 }
 0x122   : > { %v3628_v59 = vpop.f32.mrf.mxu3  ;;  %2517 = vrsqrt.f32 %v3618_v25  ;;  %v799_v11 = vadd.f32 %v786_v15, %v577_v39  ;;  %v787_v39 = vmul.f32 %v3561_v12, %v3360_v43  ;;  %v770_v43 = vmul.f32 %v3616_v23, %v3616_v23 }
 0x123   : > { %750 = vst [vmem:[%s3324_s21 + $0x50] sm:$0xff] %v3628_v59  ;;  %v1112_v36 = vmul.f32 %v1111_v5, %v3556_v6  ;;  %v1120_v22 = vmul.f32 %v2516_v13, %v1119_v27  ;;  %v782_v45 = vadd.f32 %v769_v33, %v573_v61  ;;  %v1647_v33 = vld [vmem:[%s4524_s5 + $0x120] sm:$0xff]  ;;  %v581_v61 = vmul.f32 %v3399_v57, %v3337_v35 }
 0x124   : > { %1670 = vmatpush.msra.mxu0 %v1647_v33  ;;  %2345 = vmatpush.msrb.mxu3 %v1647_v33  ;;  %vm1137_vm0 = vcmp.eq.f32.partialorder %v3618_v25, inf  ;;  %vm1139_vm1 = vcmp.eq.f32.partialorder %v3618_v25, 0.0 }
 0x125   : > { %v3641_v21 = vpop.f32.mrf.mxu0  ;;  %v930_v52 = vpop.f32.mrf.mxu1  ;;  %v1114_v30 = vsel %vm1113_vm12, %v3556_v6, %v1112_v36  ;;  %v1121_v31 = vmul.f32 0.5, %v1120_v22 }
 0x126   : > { %v991_v5 = vmul.f32 %v3641_v21, %v3641_v21  ;;  %969 = vst [vmem:[%s3324_s21 + $0x10] sm:$0xff] %v930_v52  ;;  %v1008_v27 = vmul.f32 %v930_v52, %v3401_v58  ;;  %v1117_v44 = vsel %vm1115_vm13, %v1116_v34, %v1114_v30 }
 0x127   : > { %1273 = vmatmul.f32.gmra.mxu2 %v1117_v44  ;;  %v1122_v24 = vsub.f32 1.5, %v1121_v31  ;;  %1332 = vmatmul.f32.gmra.mxu3 %v1197_v20  ;;  %v578_v44 = vmul.f32 %v3343_v38, %v3341_v37  ;;  %v574_v37 = vmul.f32 %v3459_v29, %v3459_v29  ;;  %v1128_v20 = vand.u32 2147483648, %v3584_v9 }
 0x128   : > { %v2518_v15 = vpop.eup %2517  ;;  %v3651_v36 = vadd.f32 %v991_v5, %v782_v45  ;;  %v3653_v6 = vadd.f32 %v1008_v27, %v799_v11  ;;  %v3663_v45 = vpop.f32.mrf.mxu2  ;;  %v1198_v11 = vld [vmem:[%s3433_s13 + $0x40] sm:$0xff] }
 0x129   : > { %v1123_v22 = vmul.f32 %v2516_v13, %v1122_v24  ;;  %v1131_v58 = vmul.f32 %v2518_v15, %v3618_v25  ;;  %v800_v38 = vadd.f32 %v787_v39, %v578_v44  ;;  %v783_v31 = vadd.f32 %v770_v43, %v574_v37 }
 0x12a   : > { %v720_v12 = vpop.f32.mrf.mxu3  ;;  %2519 = vrsqrt.f32 %v3651_v36  ;;  %v575_v37 = vmul.f32 %v3481_v8, %v3481_v8  ;;  %vm1149_vm2 = vcmp.eq.f32.partialorder %v3651_v36, inf  ;;  %vm1151_vm3 = vcmp.eq.f32.partialorder %v3651_v36, 0.0 }
 0x12b   : > { %751 = vst [vmem:[%s3324_s21 + $0x68] sm:$0xff] %v720_v12  ;;  %v790_v24 = vmul.f32 %v720_v12, %v3415_v1  ;;  %v1124_v13 = vmul.f32 %v1123_v22, %v3584_v9  ;;  %v1132_v34 = vmul.f32 %v2518_v15, %v1131_v58 }
 0x12d   : > { %v3676_v52 = vadd.f32 %v790_v24, %v581_v61  ;;  %v3678_v30 = vpop.f32.mrf.mxu0  ;;  %v933_v35 = vpop.f32.mrf.mxu1  ;;  %v1126_v57 = vsel %vm1125_vm14, %v3584_v9, %v1124_v13  ;;  %v1133_v1 = vmul.f32 0.5, %v1132_v34  ;;  %v1644_v9 = vld [vmem:[%s4524_s5 + $0x108] sm:$0xff]  ;;  %v582_v24 = vmul.f32 %v3417_v2, %v3358_v42 }
 0x12e   : > { %v992_v5 = vmul.f32 %v3678_v30, %v3678_v30  ;;  %970 = vst [vmem:[%s3324_s21 + $0x28] sm:$0xff] %v933_v35  ;;  %v1009_v27 = vmul.f32 %v933_v35, %v3419_v3  ;;  %v1129_v39 = vsel %vm1127_vm15, %v1128_v20, %v1126_v57  ;;  %1671 = vmatpush.msra.mxu0 %v1644_v9  ;;  %v1140_v20 = vand.u32 2147483648, %v3618_v25 }
 0x12f   : > { %1276 = vmatmul.f32.gmra.mxu2 %v1129_v39  ;;  %v1134_v33 = vsub.f32 1.5, %v1133_v1  ;;  %1335 = vmatmul.f32.gmra.mxu3 %v1198_v11  ;;  %v771_v3 = vmul.f32 %v3663_v45, %v3663_v45  ;;  %v1199_v11 = vld [vmem:[%s3433_s13 + $0x48] sm:$0xff] }
 0x130   : > { %v2520_v22 = vpop.eup %2519  ;;  %v3686_v58 = vadd.f32 %v992_v5, %v783_v31  ;;  %v3688_v44 = vadd.f32 %v1009_v27, %v800_v38  ;;  %2346 = vmatpush.msrb.mxu3 %v1644_v9  ;;  %v3704_v38 = vpop.f32.mrf.mxu2  ;;  %v789_v9 = vmul.f32 %v3628_v59, %v3397_v56  ;;  %v583_v56 = vmul.f32 %v3443_v14, %v3376_v48 }
 0x131   : > { %v1135_v43 = vmul.f32 %v2518_v15, %v1134_v33  ;;  %v1143_v12 = vmul.f32 %v2520_v22, %v3651_v36  ;;  %v784_v1 = vadd.f32 %v771_v3, %v575_v37  ;;  %v772_v33 = vmul.f32 %v3704_v38, %v3704_v38 }
 0x132   : > { %v723_v61 = vpop.f32.mrf.mxu3  ;;  %2521 = vrsqrt.f32 %v3686_v58  ;;  %vm1161_vm4 = vcmp.eq.f32.partialorder %v3686_v58, inf  ;;  %vm1163_vm5 = vcmp.eq.f32.partialorder %v3686_v58, 0.0 }
 0x133   : > { %752 = vst [vmem:[%s3324_s21 + $0x80] sm:$0xff] %v723_v61  ;;  %v791_v13 = vmul.f32 %v723_v61, %v3447_v18  ;;  %v1136_v15 = vmul.f32 %v1135_v43, %v3618_v25  ;;  %v1144_v34 = vmul.f32 %v2520_v22, %v1143_v12  ;;  %v1641_v43 = vld [vmem:[%s4524_s5 + $0xf0] sm:$0xff]  ;;  %v580_v61 = vmul.f32 %v3382_v51, %v3380_v50 }
 0x134   : > { %1672 = vmatpush.msra.mxu0 %v1641_v43  ;;  %2347 = vmatpush.msrb.mxu3 %v1641_v43  ;;  %v1152_v50 = vand.u32 2147483648, %v3651_v36  ;;  %v1200_v51 = vld [vmem:[%s3433_s13 + $0x50] sm:$0xff] }
 0x135   : > { %v3709_v35 = vadd.f32 %v791_v13, %v582_v24  ;;  %v3711_v42 = vpop.f32.mrf.mxu0  ;;  %v3713_v2 = vpop.f32.mrf.mxu1  ;;  %v1138_v18 = vsel %vm1137_vm0, %v3618_v25, %v1136_v15  ;;  %v1145_v57 = vmul.f32 0.5, %v1144_v34  ;;  %v576_v24 = vmul.f32 %v3508_v47, %v3508_v47 }
 0x136   : > { %v993_v31 = vmul.f32 %v3711_v42, %v3711_v42  ;;  %971 = vst [vmem:[%s3324_s21 + $0x40] sm:$0xff] %v3713_v2  ;;  %v1141_v5 = vsel %vm1139_vm1, %v1140_v20, %v1138_v18  ;;  %v802_v37 = vadd.f32 %v789_v9, %v580_v61 }
 0x137   : > { %1279 = vmatmul.f32.gmra.mxu2 %v1141_v5  ;;  %v1146_v27 = vsub.f32 1.5, %v1145_v57  ;;  %1338 = vmatmul.f32.gmra.mxu3 %v1199_v11  ;;  %v785_v34 = vadd.f32 %v772_v33, %v576_v24  ;;  %v1164_v24 = vand.u32 2147483648, %v3686_v58 }
 0x138   : > { %v2522_v39 = vpop.eup %2521  ;;  %v3725_v25 = vadd.f32 %v993_v31, %v784_v1 }
 0x139   : > { %v1147_v12 = vmul.f32 %v2520_v22, %v1146_v27  ;;  %v1155_v3 = vmul.f32 %v2522_v39, %v3686_v58 }
 0x13a   : > { %v726_v13 = vpop.f32.mrf.mxu3  ;;  %2523 = vrsqrt.f32 %v3725_v25  ;;  %vm1173_vm6 = vcmp.eq.f32.partialorder %v3725_v25, inf  ;;  %vm1175_vm7 = vcmp.eq.f32.partialorder %v3725_v25, 0.0 }
 0x13b   : > { %753 = vst [vmem:[%s3324_s21 + $0x98] sm:$0xff] %v726_v13  ;;  %v792_v59 = vmul.f32 %v726_v13, %v3473_v0  ;;  %v1148_v22 = vmul.f32 %v1147_v12, %v3651_v36  ;;  %v1156_v15 = vmul.f32 %v2522_v39, %v1155_v3  ;;  %v1638_v0 = vld [vmem:[%s4524_s5 + $0xd8] sm:$0xff] }
 0x13c   : > { %1673 = vmatpush.msra.mxu0 %v1638_v0  ;;  %2348 = vmatpush.msrb.mxu3 %v1638_v0  ;;  %v1176_v0 = vand.u32 2147483648, %v3725_v25 }
 0x13d   : > { %v3744_v47 = vadd.f32 %v792_v59, %v583_v56  ;;  %v3746_v20 = vpop.f32.mrf.mxu0  ;;  %v939_v11 = vpop.f32.mrf.mxu1  ;;  %v1150_v48 = vsel %vm1149_vm2, %v3651_v36, %v1148_v22  ;;  %v1157_v14 = vmul.f32 0.5, %v1156_v15 }
 0x13e   : > { %v994_v18 = vmul.f32 %v3746_v20, %v3746_v20  ;;  %972 = vst [vmem:[%s3324_s21 + $0x58] sm:$0xff] %v939_v11  ;;  %v1011_v57 = vmul.f32 %v939_v11, %v3467_v46  ;;  %v1153_v1 = vsel %vm1151_vm3, %v1152_v50, %v1150_v48  ;;  %v584_v46 = vmul.f32 %v3465_v19, %v3393_v54  ;;  %v1635_v54 = vld [vmem:[%s4524_s5 + $0xc0] sm:$0xff] }
 0x13f   : > { %1282 = vmatmul.f32.gmra.mxu2 %v1153_v1  ;;  %v1158_v31 = vsub.f32 1.5, %v1157_v14  ;;  %1341 = vmatmul.f32.gmra.mxu3 %v1200_v51  ;;  %v585_v11 = vmul.f32 %v3490_v16, %v3411_v63 }
 0x140   : > { %v2524_v36 = vpop.eup %2523  ;;  %v3757_v5 = vadd.f32 %v994_v18, %v785_v34  ;;  %v3759_v27 = vadd.f32 %v1011_v57, %v802_v37  ;;  %1674 = vmatpush.msra.mxu0 %v1635_v54  ;;  %2349 = vmatpush.msrb.mxu3 %v1635_v54  ;;  %v1202_v18 = vld [vmem:[%s3433_s13 + $0x60] sm:$0xff]  ;;  %v3847_v54 = vld [vmem:[%s4524_s5 + $0x158] sm:$0xff] }
 0x141   : > { %v1159_v33 = vmul.f32 %v2522_v39, %v1158_v31  ;;  %v1167_v9 = vmul.f32 %v2524_v36, %v3725_v25  ;;  %v1201_v39 = vld [vmem:[%s3433_s13 + $0x58] sm:$0xff] }
 0x142   : > { %v729_v43 = vpop.f32.mrf.mxu3  ;;  %2525 = vrsqrt.f32 %v3757_v5  ;;  %vm1185_vm8 = vcmp.eq.f32.partialorder %v3757_v5, inf  ;;  %vm1187_vm9 = vcmp.eq.f32.partialorder %v3757_v5, 0.0 }
 0x143   : > { %754 = vst [vmem:[%s3324_s21 + $0xb0] sm:$0xff] %v729_v43  ;;  %v793_v12 = vmul.f32 %v729_v43, %v3506_v41  ;;  %v1160_v3 = vmul.f32 %v1159_v33, %v3686_v58  ;;  %v1168_v61 = vmul.f32 %v2524_v36, %v1167_v9  ;;  %v3805_v9 = vld [vmem:[%s4524_s5 + $0x178] sm:$0xff] }
 0x144   : > { %2374 = vmatpush.msra.mxu2 %v3805_v9 }
 0x145   : > { %v3771_v13 = vadd.f32 %v793_v12, %v584_v46  ;;  %v942_v56 = vpop.f32.mrf.mxu1  ;;  %v1162_v59 = vsel %vm1161_vm4, %v3686_v58, %v1160_v3  ;;  %v1169_v22 = vmul.f32 0.5, %v1168_v61  ;;  %v1632_v58 = vld [vmem:[%s4524_s5 + $0xa8] sm:$0xff]  ;;  %v586_v46 = vmul.f32 %v3517_v60, %v3437_v10 }
 0x146   : > { %973 = vst [vmem:[%s3324_s21 + $0x70] sm:$0xff] %v942_v56  ;;  %v1012_v19 = vmul.f32 %v942_v56, %v3492_v17  ;;  %v1165_v41 = vsel %vm1163_vm5, %v1164_v24, %v1162_v59  ;;  %1675 = vmatpush.msra.mxu0 %v1632_v58  ;;  %2350 = vmatpush.msrb.mxu3 %v1632_v58  ;;  %v1188_v61 = vand.u32 2147483648, %v3757_v5 }
 0x147   : > { %1285 = vmatmul.f32.gmra.mxu2 %v1165_v41  ;;  %v1170_v15 = vsub.f32 1.5, %v1169_v22  ;;  %1344 = vmatmul.f32.gmra.mxu3 %v1201_v39  ;;  %v3837_v22 = vld [vmem:[%s4524_s5 + $0x160] sm:$0xff] }
 0x148   : > { %v2526_v34 = vpop.eup %2525  ;;  %v3781_v37 = vadd.f32 %v1012_v19, %v3676_v52  ;;  %2375 = vmatpush.msra.mxu2 %v3837_v22 }
 0x149   : > { %v1171_v50 = vmul.f32 %v2524_v36, %v1170_v15  ;;  %v1179_v51 = vmul.f32 %v2526_v34, %v3757_v5 }
 0x14a   : > { %v732_v17 = vpop.f32.mrf.mxu3 }
 0x14b   : > { %755 = vst [vmem:[%s3324_s21 + $0xc8] sm:$0xff] %v732_v17  ;;  %v794_v48 = vmul.f32 %v732_v17, %v3541_v32  ;;  %v1172_v52 = vmul.f32 %v1171_v50, %v3725_v25  ;;  %v1180_v14 = vmul.f32 %v2526_v34, %v1179_v51 }
 0x14d   : > { %v807_v57 = vadd.f32 %v794_v48, %v585_v11  ;;  %v945_v1 = vpop.f32.mrf.mxu1  ;;  %v1174_v31 = vsel %vm1173_vm6, %v3725_v25, %v1172_v52  ;;  %v1181_v36 = vmul.f32 0.5, %v1180_v14  ;;  %v1629_v25 = vld [vmem:[%s4524_s5 + $0x90] sm:$0xff] }
 0x14e   : > { %974 = vst [vmem:[%s3324_s21 + $0x88] sm:$0xff] %v945_v1  ;;  %v1013_v63 = vmul.f32 %v945_v1, %v3519_v62  ;;  %v1177_v16 = vsel %vm1175_vm7, %v1176_v0, %v1174_v31  ;;  %v3813_v62 = vld [vmem:[%s4524_s5 + $0x170] sm:$0xff]  ;;  %1676 = vmatpush.msra.mxu0 %v1629_v25  ;;  %2351 = vmatpush.msrb.mxu3 %v1629_v25  ;;  %v1614_v31 = vld [vmem:[%s4524_s5 + $0x18] sm:$0xff] }
 0x14f   : > { %1288 = vmatmul.f32.gmra.mxu2 %v1177_v16  ;;  %v1182_v32 = vsub.f32 1.5, %v1181_v36  ;;  %1347 = vmatmul.f32.gmra.mxu3 %v1202_v18  ;;  %v1617_v0 = vld [vmem:[%s4524_s5 + $0x30] sm:$0xff]  ;;  %v3893_v18 = vld [vmem:[%s4524_s5 + $0x148] sm:$0xff] }
 0x150   : > { %v3800_v33 = vadd.f32 %v1013_v63, %v3709_v35  ;;  %2358 = vmatpush.msra.mxu1 %v3813_v62  ;;  %2376 = vmatpush.msra.mxu2 %v3893_v18  ;;  %v3906_v63 = vld [vmem:[%s4524_s5 + $0x130] sm:$0xff]  ;;  %v1648_v16 = vld [vmem:[%s4524_s5 + $0x128] sm:$0xff] }
 0x151   : > { %v1183_v43 = vmul.f32 %v2526_v34, %v1182_v32  ;;  %v1611_v32 = vld [vmem:[%s4524_s5] sm:$0xff] }
 0x152   : > { %v735_v35 = vpop.f32.mrf.mxu3  ;;  %2359 = vmatpush.msra.mxu1 %v3847_v54  ;;  %2377 = vmatpush.msra.mxu2 %v3906_v63 }
 0x153   : > { %756 = vst [vmem:[%s3324_s21 + $0xe0] sm:$0xff] %v735_v35  ;;  %v795_v12 = vmul.f32 %v735_v35, %v3578_v53  ;;  %v1184_v3 = vmul.f32 %v1183_v43, %v3757_v5  ;;  %v1626_v53 = vld [vmem:[%s4524_s5 + $0x78] sm:$0xff] }
 0x154   : > { %1677 = vmatpush.msra.mxu0 %v1626_v53  ;;  %2352 = vmatpush.msrb.mxu3 %v1626_v53  ;;  %v3955_v53 = vld [vmem:[%s4524_s5 + $0xd0] sm:$0xff] }
 0x155   : > { %v808_v24 = vadd.f32 %v795_v12, %v586_v46  ;;  %v948_v39 = vpop.f32.mrf.mxu1  ;;  %v1186_v56 = vsel %vm1185_vm8, %v3757_v5, %v1184_v3  ;;  %v587_v5 = vmul.f32 %v3546_v7, %v3459_v29  ;;  %v3922_v46 = vld [vmem:[%s4524_s5 + $0x118] sm:$0xff]  ;;  %v1645_v12 = vld [vmem:[%s4524_s5 + $0x110] sm:$0xff] }
 0x156   : > { %975 = vst [vmem:[%s3324_s21 + $0xa0] sm:$0xff] %v948_v39  ;;  %v1014_v59 = vmul.f32 %v948_v39, %v3548_v40  ;;  %v1189_v10 = vsel %vm1187_vm9, %v1188_v61, %v1186_v56  ;;  %2378 = vmatpush.msra.mxu2 %v3922_v46 }
 0x157   : > { %1291 = vmatmul.f32.gmra.mxu2 %v1189_v10  ;;  %v1639_v10 = vld [vmem:[%s4524_s5 + $0xe0] sm:$0xff] }
 0x158   : > { %v3829_v60 = vadd.f32 %v1014_v59, %v3744_v47  ;;  %v3944_v59 = vld [vmem:[%s4524_s5 + $0xe8] sm:$0xff] }
 0x15a   : > { %v738_v40 = vpop.f32.mrf.mxu3 }
 0x15b   : > { %757 = vst [vmem:[%s3324_s21 + $0xf8] sm:$0xff] %v738_v40  ;;  %v796_v47 = vmul.f32 %v738_v40, %v3616_v23  ;;  %v588_v23 = vmul.f32 %v3572_v26, %v3481_v8  ;;  %v1636_v40 = vld [vmem:[%s4524_s5 + $0xc8] sm:$0xff] }
 0x15d   : > { %v809_v19 = vadd.f32 %v796_v47, %v587_v5  ;;  %v951_v41 = vpop.f32.mrf.mxu1 }
 0x15e   : > { %976 = vst [vmem:[%s3324_s21 + $0xb8] sm:$0xff] %v951_v41  ;;  %v1015_v15 = vmul.f32 %v951_v41, %v3574_v28 }
 0x160   : > { %v3853_v29 = vadd.f32 %v1015_v15, %v3771_v13 }
 0x162   : > { %v741_v7 = vpop.f32.mrf.mxu3 }
 0x163   : > { %758 = vst [vmem:[%s3324_s21 + $0x110] sm:$0xff] %v741_v7  ;;  %v797_v34 = vmul.f32 %v741_v7, %v3663_v45 }
 0x165   : > { %v810_v58 = vadd.f32 %v797_v34, %v588_v23  ;;  %v954_v50 = vpop.f32.mrf.mxu1  ;;  %v1630_v23 = vld [vmem:[%s4524_s5 + $0x98] sm:$0xff]  ;;  %v3982_v34 = vld [vmem:[%s4524_s5 + $0xa0] sm:$0xff] }
 0x166   : > { %977 = vst [vmem:[%s3324_s21 + $0xd0] sm:$0xff] %v954_v50  ;;  %v1016_v51 = vmul.f32 %v954_v50, %v3603_v55  ;;  %v1623_v55 = vld [vmem:[%s4524_s5 + $0x60] sm:$0xff] }
 0x167   : > { %1678 = vmatpush.msra.mxu0 %v1623_v55  ;;  %2353 = vmatpush.msrb.mxu3 %v1623_v55  ;;  %v1621_v55 = vld [vmem:[%s4524_s5 + $0x50] sm:$0xff] }
 0x168   : > { %v3861_v17 = vadd.f32 %v1016_v51, %v807_v57  ;;  %v1651_v57 = vld [vmem:[%s4524_s5 + $0x140] sm:$0xff] }
 0x169   : > { %2360 = vmatpush.msra.mxu1 %v1651_v57  ;;  %v1627_v51 = vld [vmem:[%s4524_s5 + $0x80] sm:$0xff] }
 0x16a   : > { %v744_v28 = vpop.f32.mrf.mxu3 }
 0x16b   : > { %759 = vst [vmem:[%s3324_s21 + $0x128] sm:$0xff] %v744_v28  ;;  %v798_v13 = vmul.f32 %v744_v28, %v3704_v38  ;;  %2361 = vmatpush.msra.mxu1 %v1648_v16  ;;  %v3992_v28 = vld [vmem:[%s4524_s5 + $0x88] sm:$0xff] }
 0x16d   : > { %v3866_v11 = vadd.f32 %v798_v13, %v3612_v4  ;;  %v957_v48 = vpop.f32.mrf.mxu1  ;;  %v1620_v4 = vld [vmem:[%s4524_s5 + $0x48] sm:$0xff]  ;;  %2362 = vmatpush.msra.mxu1 %v1645_v12 }
 0x16e   : > { %978 = vst [vmem:[%s3324_s21 + $0xe8] sm:$0xff] %v957_v48  ;;  %v1017_v8 = vmul.f32 %v957_v48, %v3641_v21  ;;  %v3883_v21 = vld [vmem:[%s4523_s4] ss:$0 sm:$0xff]  ;;  %1679 = vmatpush.msra.mxu0 %v1620_v4  ;;  %2354 = vmatpush.msrb.mxu3 %v1620_v4  ;;  %v1624_v48 = vld [vmem:[%s4524_s5 + $0x68] sm:$0xff] }
 0x170   : > { %v3870_v26 = vadd.f32 %v1017_v8, %v808_v24  ;;  %1680 = vmatpush.msra.mxu0 %v1617_v0  ;;  %2355 = vmatpush.msrb.mxu3 %v1617_v0  ;;  %v1642_v24 = vld [vmem:[%s4524_s5 + $0xf8] sm:$0xff]  ;;  %v4002_v8 = vld [vmem:[%s4524_s5 + $0x70] sm:$0xff] }
 0x171   : > { %2363 = vmatpush.msra.mxu1 %v1642_v24 }
 0x172   : > { %v1312_v45 = vpop.f32.mrf.mxu3  ;;  %1681 = vmatpush.msra.mxu0 %v1614_v31  ;;  %2356 = vmatpush.msrb.mxu3 %v1614_v31 }
 0x173   : > { %2364 = vmatpush.msra.mxu1 %v1639_v10 }
 0x174   : > { %1682 = vmatpush.msra.mxu0 %v1611_v32  ;;  %2357 = vmatpush.msrb.mxu3 %v1611_v32  ;;  %v1615_v32 = vld [vmem:[%s4524_s5 + $0x20] sm:$0xff] }
 0x175   : > { %v960_v52 = vpop.f32.mrf.mxu1  ;;  %2365 = vmatpush.msra.mxu1 %v1636_v40 }
 0x176   : > { %979 = vst [vmem:[%s3324_s21 + $0x100] sm:$0xff] %v960_v52  ;;  %v1018_v38 = vmul.f32 %v960_v52, %v3678_v30  ;;  %1723 = vmatpush.msrb.mxu0 %v3813_v62  ;;  %v4013_v52 = vld [vmem:[%s4524_s5 + $0x58] sm:$0xff] }
 0x178   : > { %v3885_v14 = vadd.f32 %v1018_v38, %v809_v19  ;;  %1724 = vmatpush.msrb.mxu0 %v3847_v54  ;;  %v3967_v54 = vld [vmem:[%s4524_s5 + $0xb8] sm:$0xff]  ;;  %v1633_v19 = vld [vmem:[%s4524_s5 + $0xb0] sm:$0xff] }
 0x179   : > { %2366 = vmatpush.msra.mxu1 %v1633_v19 }
 0x17a   : > { %v1256_v30 = vpop.f32.mrf.mxu2  ;;  %v1315_v1 = vpop.f32.mrf.mxu3  ;;  %1725 = vmatpush.msrb.mxu0 %v1651_v57  ;;  %v1618_v57 = vld [vmem:[%s4524_s5 + $0x38] sm:$0xff] }
 0x17b   : > { %v1257_v36 = vadd.f32 %v3883_v21, %v1256_v30  ;;  %2367 = vmatpush.msra.mxu1 %v1630_v23 }
 0x17c   : > { %1726 = vmatpush.msrb.mxu0 %v1648_v16 }
 0x17d   : > { %v3914_v25 = vadd.f32 %v1312_v45, %v1257_v36  ;;  %v963_v43 = vpop.f32.mrf.mxu1  ;;  %2368 = vmatpush.msra.mxu1 %v1627_v51 }
 0x17e   : > { %980 = vst [vmem:[%s3324_s21 + $0x118] sm:$0xff] %v963_v43  ;;  %v1019_v35 = vmul.f32 %v963_v43, %v3711_v42  ;;  %v3934_v42 = vld [vmem:[%s4524_s5 + $0x100] sm:$0xff]  ;;  %1727 = vmatpush.msrb.mxu0 %v1645_v12  ;;  %v4036_v43 = vld [vmem:[%s4524_s5 + $0x28] sm:$0xff] }
 0x17f   : > { %v2296_v3 = vmul.f32 -1.442695, %v3914_v25  ;;  %2379 = vmatpush.msra.mxu2 %v3934_v42  ;;  %2369 = vmatpush.msra.mxu1 %v1624_v48 }
 0x180   : > { %v3929_v61 = vadd.f32 %v1019_v35, %v810_v58  ;;  %1728 = vmatpush.msrb.mxu0 %v1642_v24  ;;  %v1612_v24 = vld [vmem:[%s4524_s5 + $0x8] sm:$0xff] }
 0x181   : > { %2527 = vpow2.f32 %v2296_v3  ;;  %2380 = vmatpush.msra.mxu2 %v3944_v59  ;;  %2370 = vmatpush.msra.mxu1 %v1621_v55 }
 0x182   : > { %v1259_v39 = vpop.f32.mrf.mxu2  ;;  %v1318_v56 = vpop.f32.mrf.mxu3  ;;  %1729 = vmatpush.msrb.mxu0 %v1639_v10 }
 0x183   : > { %v1260_v62 = vadd.f32 %v3883_v21, %v1259_v39  ;;  %2381 = vmatpush.msra.mxu2 %v3955_v53  ;;  %2371 = vmatpush.msra.mxu1 %v1618_v57  ;;  %v4047_v39 = vld [vmem:[%s4524_s5 + $0x10] sm:$0xff] }
 0x184   : > { %1730 = vmatpush.msrb.mxu0 %v1636_v40 }
 0x185   : > { %v3960_v5 = vadd.f32 %v1315_v1, %v1260_v62  ;;  %v966_v47 = vpop.f32.mrf.mxu1  ;;  %2382 = vmatpush.msra.mxu2 %v3967_v54  ;;  %v4025_v1 = vld [vmem:[%s4524_s5 + $0x40] sm:$0xff]  ;;  %2372 = vmatpush.msra.mxu1 %v1615_v32 }
 0x186   : > { %981 = vst [vmem:[%s3324_s21 + $0x130] sm:$0xff] %v966_v47  ;;  %1731 = vmatpush.msrb.mxu0 %v1633_v19 }
 0x187   : > { %v2528_v41 = vpop.eup %2527  ;;  %v2297_v15 = vmul.f32 -1.442695, %v3960_v5  ;;  %2383 = vmatpush.msra.mxu2 %v3982_v34  ;;  %2373 = vmatpush.msra.mxu1 %v1612_v24 }
 0x188   : > { %v3974_v7 = vadd.f32 1.0, %v2528_v41  ;;  %1732 = vmatpush.msrb.mxu0 %v1630_v23 }
 0x189   : > { %2529 = vpow2.f32 %v2297_v15  ;;  %2384 = vmatpush.msra.mxu2 %v3992_v28 }
 0x18a   : > { %2531 = vrcp.f32 %v3974_v7  ;;  %v1262_v58 = vpop.f32.mrf.mxu2  ;;  %v1321_v50 = vpop.f32.mrf.mxu3  ;;  %v1414_v3 = vand.u32 2147483648, %v3974_v7  ;;  %1733 = vmatpush.msrb.mxu0 %v1627_v51  ;;  %v1412_v10 = vand.u32 2147483647, %v3974_v7  ;;  %vm1408_vm11 = vweird.f32 %v3974_v7 }
 0x18b   : > { %v1263_v13 = vadd.f32 %v3883_v21, %v1262_v58  ;;  %2385 = vmatpush.msra.mxu2 %v4002_v8 }
 0x18c   : > { %1734 = vmatpush.msrb.mxu0 %v1624_v48  ;;  %v1415_v15 = vor.u32 1.1754944e-38, %v1414_v3  ;;  %vm1413_vm13 = vcmp.eq.f32.partialorder %v1412_v10, 8.507059e+37 }
 0x18d   : > { %v4004_v45 = vadd.f32 %v1318_v56, %v1263_v13  ;;  %2386 = vmatpush.msra.mxu2 %v4013_v52 }
 0x18e   : > { %1735 = vmatpush.msrb.mxu0 %v1621_v55 }
 0x18f   : > { %v2530_v38 = vpop.eup %2529  ;;  %v2298_v4 = vmul.f32 -1.442695, %v4004_v45  ;;  %2387 = vmatpush.msra.mxu2 %v4025_v1 }
 0x190   : > { %v2532_v0 = vpop.eup %2531  ;;  %v4017_v30 = vadd.f32 1.0, %v2530_v38  ;;  %1736 = vmatpush.msrb.mxu0 %v1618_v57 }
 0x191   : > { %v1404_v31 = vmul.f32 %v2532_v0, %v3974_v7  ;;  %2533 = vpow2.f32 %v2298_v4  ;;  %2388 = vmatpush.msra.mxu2 %v4036_v43  ;;  %vm1409_vm10 = vweird.f32 %v2532_v0 }
 0x192   : > { %2535 = vrcp.f32 %v4017_v30  ;;  %v1265_v36 = vpop.f32.mrf.mxu2  ;;  %v1324_v16 = vpop.f32.mrf.mxu3  ;;  %vm1410_vm12 = vmor %vm1408_vm11, %vm1409_vm10  ;;  %1737 = vmatpush.msrb.mxu0 %v1615_v32  ;;  %vm1423_vm15 = vweird.f32 %v4017_v30 }
 0x193   : > { %v1405_v35 = vsub.f32 1.0, %v1404_v31  ;;  %v1266_v12 = vadd.f32 %v3883_v21, %v1265_v36  ;;  %2389 = vmatpush.msra.mxu2 %v4047_v39  ;;  %v1429_v31 = vand.u32 2147483648, %v4017_v30 }
 0x194   : > { %1738 = vmatpush.msrb.mxu0 %v1612_v24 }
 0x195   : > { %v1406_v56 = vmul.f32 %v2532_v0, %v1405_v35  ;;  %v4050_v62 = vadd.f32 %v1321_v50, %v1266_v12  ;;  %v1430_v32 = vor.u32 1.1754944e-38, %v1429_v31 }
 0x197   : > { %v2534_v40 = vpop.eup %2533  ;;  %v1407_v47 = vadd.f32 %v2532_v0, %v1406_v56  ;;  %v2299_v19 = vmul.f32 -1.442695, %v4050_v62 }
 0x198   : > { %v2536_v41 = vpop.eup %2535  ;;  %v1392_v23 = vadd.f32 1.0, %v2534_v40 }
 0x199   : > { %v1411_v58 = vsel %vm1410_vm12, %v2532_v0, %v1407_v47  ;;  %v1419_v50 = vmul.f32 %v2536_v41, %v4017_v30  ;;  %2537 = vpow2.f32 %v2299_v19  ;;  %vm1424_vm14 = vweird.f32 %v2536_v41 }
 0x19a   : > { %v1416_v51 = vsel %vm1413_vm13, %v1415_v15, %v1411_v58  ;;  %2539 = vrcp.f32 %v1392_v23  ;;  %v1268_v13 = vpop.f32.mrf.mxu2  ;;  %v1327_v48 = vpop.f32.mrf.mxu3  ;;  %v1427_v0 = vand.u32 2147483647, %v4017_v30  ;;  %vm1425_vm0 = vmor %vm1423_vm15, %vm1424_vm14  ;;  %v1444_v19 = vand.u32 2147483648, %v1392_v23 }
 0x19b   : > { %v4057_v38 = vmul.f32 %v1416_v51, %v3914_v25  ;;  %v1420_v7 = vsub.f32 1.0, %v1419_v50  ;;  %v1269_v4 = vadd.f32 %v3883_v21, %v1268_v13  ;;  %vm1438_vm3 = vweird.f32 %v1392_v23 }
 0x19c   : > { %vm1428_vm1 = vcmp.eq.f32.partialorder %v1427_v0, 8.507059e+37  ;;  %v1445_v13 = vor.u32 1.1754944e-38, %v1444_v19 }
 0x19d   : > { %v1421_v55 = vmul.f32 %v2536_v41, %v1420_v7  ;;  %v4062_v36 = vadd.f32 %v1324_v16, %v1269_v4  ;;  %1683 = vmatmul.f32.vlgmr.msra.gmra.mxu0 %v4057_v38 }
 0x19e   : > { %1779 = vmatpush.msra.mxu0 %v3805_v9 }
 0x19f   : > { %v2538_v35 = vpop.eup %2537  ;;  %v1422_v57 = vadd.f32 %v2536_v41, %v1421_v55  ;;  %v2300_v25 = vmul.f32 -1.442695, %v4062_v36 }
 0x1a0   : > { %v2540_v12 = vpop.eup %2539  ;;  %v1393_v3 = vadd.f32 1.0, %v2538_v35  ;;  %1780 = vmatpush.msra.mxu0 %v3837_v22 }
 0x1a1   : > { %v1426_v56 = vsel %vm1425_vm0, %v2536_v41, %v1422_v57  ;;  %v1434_v10 = vmul.f32 %v2540_v12, %v1392_v23  ;;  %2541 = vpow2.f32 %v2300_v25  ;;  %vm1439_vm2 = vweird.f32 %v2540_v12 }
 0x1a2   : > { %v1431_v16 = vsel %vm1428_vm1, %v1430_v32, %v1426_v56  ;;  %2543 = vrcp.f32 %v1393_v3  ;;  %v1271_v24 = vpop.f32.mrf.mxu2  ;;  %v1330_v40 = vpop.f32.mrf.mxu3  ;;  %1781 = vmatpush.msra.mxu0 %v3893_v18  ;;  %v1442_v41 = vand.u32 2147483647, %v1392_v23  ;;  %vm1440_vm4 = vmor %vm1438_vm3, %vm1439_vm2  ;;  %v1459_v35 = vand.u32 2147483648, %v1393_v3 }
 0x1a3   : > { %v4070_v30 = vmul.f32 %v1431_v16, %v3960_v5  ;;  %v1435_v47 = vsub.f32 1.0, %v1434_v10  ;;  %v1272_v9 = vadd.f32 %v3883_v21, %v1271_v24  ;;  %v1457_v57 = vand.u32 2147483647, %v1393_v3 }
 0x1a4   : > { %1782 = vmatpush.msra.mxu0 %v3906_v63  ;;  %vm1443_vm5 = vcmp.eq.f32.partialorder %v1442_v41, 8.507059e+37  ;;  %vm1453_vm7 = vweird.f32 %v1393_v3  ;;  %v1460_v56 = vor.u32 1.1754944e-38, %v1459_v35 }
 0x1a5   : > { %v1436_v15 = vmul.f32 %v2540_v12, %v1435_v47  ;;  %v4074_v58 = vadd.f32 %v1327_v48, %v1272_v9  ;;  %1686 = vmatmul.f32.gmra.mxu0 %v4070_v30  ;;  %vm1458_vm9 = vcmp.eq.f32.partialorder %v1457_v57, 8.507059e+37 }
 0x1a6   : > { %1783 = vmatpush.msra.mxu0 %v3922_v46 }
 0x1a7   : > { %v2542_v22 = vpop.eup %2541  ;;  %v1437_v50 = vadd.f32 %v2540_v12, %v1436_v15  ;;  %v2301_v5 = vmul.f32 -1.442695, %v4074_v58 }
 0x1a8   : > { %v2544_v51 = vpop.eup %2543  ;;  %v4079_v7 = vadd.f32 1.0, %v2542_v22  ;;  %1784 = vmatpush.msra.mxu0 %v3934_v42 }
 0x1a9   : > { %v1441_v18 = vsel %vm1440_vm4, %v2540_v12, %v1437_v50  ;;  %v1449_v48 = vmul.f32 %v2544_v51, %v1393_v3  ;;  %2545 = vpow2.f32 %v2301_v5  ;;  %vm1454_vm6 = vweird.f32 %v2544_v51 }
 0x1aa   : > { %v1446_v4 = vsel %vm1443_vm5, %v1445_v13, %v1441_v18  ;;  %2547 = vrcp.f32 %v4079_v7  ;;  %v1274_v63 = vpop.f32.mrf.mxu2  ;;  %v1333_v31 = vpop.f32.mrf.mxu3  ;;  %1785 = vmatpush.msra.mxu0 %v3944_v59  ;;  %vm1455_vm8 = vmor %vm1453_vm7, %vm1454_vm6  ;;  %v1474_v19 = vand.u32 2147483648, %v4079_v7  ;;  %v1472_v15 = vand.u32 2147483647, %v4079_v7 }
 0x1ab   : > { %v4085_v23 = vmul.f32 %v1446_v4, %v4004_v45  ;;  %v1450_v55 = vsub.f32 1.0, %v1449_v48  ;;  %v1275_v0 = vadd.f32 %v3883_v21, %v1274_v63  ;;  %vm1468_vm11 = vweird.f32 %v4079_v7 }
 0x1ac   : > { %1786 = vmatpush.msra.mxu0 %v3955_v53  ;;  %vm1473_vm13 = vcmp.eq.f32.partialorder %v1472_v15, 8.507059e+37 }
 0x1ad   : > { %v1451_v46 = vmul.f32 %v2544_v51, %v1450_v55  ;;  %v4089_v25 = vadd.f32 %v1330_v40, %v1275_v0  ;;  %1689 = vmatmul.f32.gmra.mxu0 %v4085_v23 }
 0x1ae   : > { %1787 = vmatpush.msra.mxu0 %v3967_v54 }
 0x1af   : > { %v2546_v12 = vpop.eup %2545  ;;  %v1452_v42 = vadd.f32 %v2544_v51, %v1451_v46  ;;  %v2302_v45 = vmul.f32 -1.442695, %v4089_v25 }
 0x1b0   : > { %v2548_v32 = vpop.eup %2547  ;;  %v4094_v10 = vadd.f32 1.0, %v2546_v12  ;;  %1788 = vmatpush.msra.mxu0 %v3982_v34 }
 0x1b1   : > { %v1456_v59 = vsel %vm1455_vm8, %v2544_v51, %v1452_v42  ;;  %v1464_v16 = vmul.f32 %v2548_v32, %v4079_v7  ;;  %2549 = vpow2.f32 %v2302_v45  ;;  %vm1469_vm10 = vweird.f32 %v2548_v32 }
 0x1b2   : > { %v1461_v24 = vsel %vm1458_vm9, %v1460_v56, %v1456_v59  ;;  %2551 = vrcp.f32 %v4094_v10  ;;  %v1277_v53 = vpop.f32.mrf.mxu2  ;;  %v1336_v40 = vpop.f32.mrf.mxu3  ;;  %1789 = vmatpush.msra.mxu0 %v3992_v28  ;;  %vm1470_vm12 = vmor %vm1468_vm11, %vm1469_vm10  ;;  %v1475_v28 = vor.u32 1.1754944e-38, %v1474_v19  ;;  %v1489_v63 = vand.u32 2147483648, %v4094_v10 }
 0x1b3   : > { %v1601_v3 = vmul.f32 %v1461_v24, %v4050_v62  ;;  %v1465_v47 = vsub.f32 1.0, %v1464_v16  ;;  %v1278_v9 = vadd.f32 %v3883_v21, %v1277_v53  ;;  %v1487_v55 = vand.u32 2147483647, %v4094_v10 }
 0x1b4   : > { %1790 = vmatpush.msra.mxu0 %v4002_v8  ;;  %vm1483_vm15 = vweird.f32 %v4094_v10 }
 0x1b5   : > { %v1466_v54 = vmul.f32 %v2548_v32, %v1465_v47  ;;  %v4105_v41 = vadd.f32 %v1333_v31, %v1278_v9  ;;  %1692 = vmatmul.f32.gmra.mxu0 %v1601_v3  ;;  %1748 = vmatmul.f32.vlgmr.msra.gmra.mxu1 %v1601_v3  ;;  %vm1488_vm1 = vcmp.eq.f32.partialorder %v1487_v55, 8.507059e+37 }
 0x1b6   : > { %1804 = vmatmul.f32.vlgmr.msra.gmra.mxu2 %v1601_v3  ;;  %1791 = vmatpush.msra.mxu0 %v4013_v52 }
 0x1b7   : > { %v2550_v34 = vpop.eup %2549  ;;  %v1467_v62 = vadd.f32 %v2548_v32, %v1466_v54  ;;  %v2303_v22 = vmul.f32 -1.442695, %v4105_v41 }
 0x1b8   : > { %v2552_v50 = vpop.eup %2551  ;;  %v1396_v5 = vadd.f32 1.0, %v2550_v34  ;;  %1792 = vmatpush.msra.mxu0 %v4025_v1 }
 0x1b9   : > { %v1471_v51 = vsel %vm1470_vm12, %v2548_v32, %v1467_v62  ;;  %v1479_v13 = vmul.f32 %v2552_v50, %v4094_v10  ;;  %2553 = vpow2.f32 %v2303_v22  ;;  %vm1484_vm14 = vweird.f32 %v2552_v50 }
 0x1ba   : > { %v1476_v18 = vsel %vm1473_vm13, %v1475_v28, %v1471_v51  ;;  %2555 = vrcp.f32 %v1396_v5  ;;  %v1280_v8 = vpop.f32.mrf.mxu2  ;;  %v1339_v31 = vpop.f32.mrf.mxu3  ;;  %1793 = vmatpush.msra.mxu0 %v4036_v43  ;;  %vm1485_vm0 = vmor %vm1483_vm15, %vm1484_vm14  ;;  %v1490_v43 = vor.u32 1.1754944e-38, %v1489_v63  ;;  %v1504_v16 = vand.u32 2147483648, %v1396_v5 }
 0x1bb   : > { %v1602_v7 = vmul.f32 %v1476_v18, %v4062_v36  ;;  %v1480_v48 = vsub.f32 1.0, %v1479_v13  ;;  %v1281_v4 = vadd.f32 %v3883_v21, %v1280_v8  ;;  %v1502_v24 = vand.u32 2147483647, %v1396_v5 }
 0x1bc   : > { %1794 = vmatpush.msra.mxu0 %v4047_v39  ;;  %vm1498_vm3 = vweird.f32 %v1396_v5 }
 0x1bd   : > { %v1481_v52 = vmul.f32 %v2552_v50, %v1480_v48  ;;  %v4118_v0 = vadd.f32 %v1336_v40, %v1281_v4  ;;  %1695 = vmatmul.f32.gmra.mxu0 %v1602_v7  ;;  %1751 = vmatmul.f32.gmra.mxu1 %v1602_v7  ;;  %vm1503_vm5 = vcmp.eq.f32.partialorder %v1502_v24, 8.507059e+37 }
 0x1be   : > { %1807 = vmatmul.f32.gmra.mxu2 %v1602_v7 }
 0x1bf   : > { %v2554_v1 = vpop.eup %2553  ;;  %v1482_v36 = vadd.f32 %v2552_v50, %v1481_v52  ;;  %v2304_v35 = vmul.f32 -1.442695, %v4118_v0 }
 0x1c0   : > { %v2556_v46 = vpop.eup %2555  ;;  %v1397_v57 = vadd.f32 1.0, %v2554_v1 }
 0x1c1   : > { %v1486_v12 = vsel %vm1485_vm0, %v2552_v50, %v1482_v36  ;;  %v1494_v42 = vmul.f32 %v2556_v46, %v1396_v5  ;;  %2557 = vpow2.f32 %v2304_v35  ;;  %vm1499_vm2 = vweird.f32 %v2556_v46 }
 0x1c2   : > { %v1491_v45 = vsel %vm1488_vm1, %v1490_v43, %v1486_v12  ;;  %2559 = vrcp.f32 %v1397_v57  ;;  %v1283_v32 = vpop.f32.mrf.mxu2  ;;  %v1342_v40 = vpop.f32.mrf.mxu3  ;;  %vm1500_vm4 = vmor %vm1498_vm3, %vm1499_vm2  ;;  %v1519_v13 = vand.u32 2147483648, %v1397_v57  ;;  %v1517_v18 = vand.u32 2147483647, %v1397_v57 }
 0x1c3   : > { %v1603_v56 = vmul.f32 %v1491_v45, %v4074_v58  ;;  %v1495_v39 = vsub.f32 1.0, %v1494_v42  ;;  %v1284_v59 = vadd.f32 %v3883_v21, %v1283_v32  ;;  %v1505_v58 = vor.u32 1.1754944e-38, %v1504_v16 }
 0x1c4   : > { %vm1513_vm7 = vweird.f32 %v1397_v57  ;;  %vm1518_vm9 = vcmp.eq.f32.partialorder %v1517_v18, 8.507059e+37 }
 0x1c5   : > { %v1496_v10 = vmul.f32 %v2556_v46, %v1495_v39  ;;  %v4125_v53 = vadd.f32 %v1339_v31, %v1284_v59  ;;  %1698 = vmatmul.f32.gmra.mxu0 %v1603_v56  ;;  %1754 = vmatmul.f32.gmra.mxu1 %v1603_v56 }
 0x1c6   : > { %1810 = vmatmul.f32.gmra.mxu2 %v1603_v56 }
 0x1c7   : > { %v2558_v3 = vpop.eup %2557  ;;  %v1497_v47 = vadd.f32 %v2556_v46, %v1496_v10  ;;  %v2305_v9 = vmul.f32 -1.442695, %v4125_v53 }
 0x1c8   : > { %v2560_v19 = vpop.eup %2559  ;;  %v1398_v54 = vadd.f32 1.0, %v2558_v3 }
 0x1c9   : > { %v1501_v15 = vsel %vm1500_vm4, %v2556_v46, %v1497_v47  ;;  %v1509_v34 = vmul.f32 %v2560_v19, %v1397_v57  ;;  %2561 = vpow2.f32 %v2305_v9  ;;  %vm1514_vm6 = vweird.f32 %v2560_v19 }
 0x1ca   : > { %v1506_v62 = vsel %vm1503_vm5, %v1505_v58, %v1501_v15  ;;  %2563 = vrcp.f32 %v1398_v54  ;;  %v1286_v22 = vpop.f32.mrf.mxu2  ;;  %vm1515_vm8 = vmor %vm1513_vm7, %vm1514_vm6  ;;  %v1345_v52 = vpop.f32.mrf.mxu3  ;;  %v1534_v57 = vand.u32 2147483648, %v1398_v54  ;;  %v1532_v45 = vand.u32 2147483647, %v1398_v54 }
 0x1cb   : > { %v1604_v50 = vmul.f32 %v1506_v62, %v4089_v25  ;;  %v1510_v28 = vsub.f32 1.0, %v1509_v34  ;;  %v1287_v51 = vadd.f32 %v3883_v21, %v1286_v22  ;;  %v1520_v25 = vor.u32 1.1754944e-38, %v1519_v13 }
 0x1cc   : > { %vm1528_vm11 = vweird.f32 %v1398_v54  ;;  %vm1533_vm13 = vcmp.eq.f32.partialorder %v1532_v45, 8.507059e+37 }
 0x1cd   : > { %v1511_v5 = vmul.f32 %v2560_v19, %v1510_v28  ;;  %v4130_v8 = vadd.f32 %v1342_v40, %v1287_v51  ;;  %1701 = vmatmul.f32.gmra.mxu0 %v1604_v50  ;;  %1757 = vmatmul.f32.gmra.mxu1 %v1604_v50 }
 0x1ce   : > { %1813 = vmatmul.f32.gmra.mxu2 %v1604_v50 }
 0x1cf   : > { %v2562_v7 = vpop.eup %2561  ;;  %v1512_v48 = vadd.f32 %v2560_v19, %v1511_v5  ;;  %v2306_v4 = vmul.f32 -1.442695, %v4130_v8 }
 0x1d0   : > { %v2564_v63 = vpop.eup %2563  ;;  %v1399_v31 = vadd.f32 1.0, %v2562_v7 }
 0x1d1   : > { %v1516_v55 = vsel %vm1515_vm8, %v2560_v19, %v1512_v48  ;;  %v1524_v1 = vmul.f32 %v2564_v63, %v1398_v54  ;;  %2565 = vpow2.f32 %v2306_v4  ;;  %vm1529_vm10 = vweird.f32 %v2564_v63 }
 0x1d2   : > { %v1521_v36 = vsel %vm1518_vm9, %v1520_v25, %v1516_v55  ;;  %2567 = vrcp.f32 %v1399_v31  ;;  %v1289_v35 = vpop.f32.mrf.mxu2  ;;  %vm1530_vm12 = vmor %vm1528_vm11, %vm1529_vm10  ;;  %v1348_v9 = vpop.f32.mrf.mxu3  ;;  %v1549_v54 = vand.u32 2147483648, %v1399_v31  ;;  %v1547_v62 = vand.u32 2147483647, %v1399_v31 }
 0x1d3   : > { %v1605_v46 = vmul.f32 %v1521_v36, %v4105_v41  ;;  %v1525_v43 = vsub.f32 1.0, %v1524_v1  ;;  %v1290_v12 = vadd.f32 %v3883_v21, %v1289_v35  ;;  %v1535_v41 = vor.u32 1.1754944e-38, %v1534_v57 }
 0x1d4   : > { %vm1543_vm15 = vweird.f32 %v1399_v31  ;;  %vm1548_vm1 = vcmp.eq.f32.partialorder %v1547_v62, 8.507059e+37 }
 0x1d5   : > { %v1526_v42 = vmul.f32 %v2564_v63, %v1525_v43  ;;  %v4135_v32 = vadd.f32 %v1345_v52, %v1290_v12  ;;  %1704 = vmatmul.f32.gmra.mxu0 %v1605_v46  ;;  %1760 = vmatmul.f32.gmra.mxu1 %v1605_v46 }
 0x1d6   : > { %1816 = vmatmul.f32.gmra.mxu2 %v1605_v46 }
 0x1d7   : > { %v2566_v56 = vpop.eup %2565  ;;  %v1527_v39 = vadd.f32 %v2564_v63, %v1526_v42  ;;  %v2307_v59 = vmul.f32 -1.442695, %v4135_v32 }
 0x1d8   : > { %v2568_v16 = vpop.eup %2567  ;;  %v1400_v10 = vadd.f32 1.0, %v2566_v56 }
 0x1d9   : > { %v1531_v24 = vsel %vm1530_vm12, %v2564_v63, %v1527_v39  ;;  %v1539_v40 = vmul.f32 %v2568_v16, %v1399_v31  ;;  %2569 = vpow2.f32 %v2307_v59  ;;  %vm1544_vm14 = vweird.f32 %v2568_v16 }
 0x1da   : > { %v1536_v3 = vsel %vm1533_vm13, %v1535_v41, %v1531_v24  ;;  %2571 = vrcp.f32 %v1400_v10  ;;  %v1292_v47 = vpop.f32.mrf.mxu2  ;;  %vm1545_vm0 = vmor %vm1543_vm15, %vm1544_vm14  ;;  %v1564_v63 = vand.u32 2147483648, %v1400_v10  ;;  %v1562_v52 = vand.u32 2147483647, %v1400_v10 }
 0x1db   : > { %v1606_v19 = vmul.f32 %v1536_v3, %v4118_v0  ;;  %v1540_v58 = vsub.f32 1.0, %v1539_v40  ;;  %v1293_v15 = vadd.f32 %v3883_v21, %v1292_v47  ;;  %v1550_v0 = vor.u32 1.1754944e-38, %v1549_v54 }
 0x1dc   : > { %vm1558_vm3 = vweird.f32 %v1400_v10  ;;  %v1565_v36 = vor.u32 1.1754944e-38, %v1564_v63  ;;  %vm1563_vm5 = vcmp.eq.f32.partialorder %v1562_v52, 8.507059e+37 }
 0x1dd   : > { %v1541_v34 = vmul.f32 %v2568_v16, %v1540_v58  ;;  %v4140_v22 = vadd.f32 %v1348_v9, %v1293_v15  ;;  %1707 = vmatmul.f32.gmra.mxu0 %v1606_v19  ;;  %1763 = vmatmul.f32.gmra.mxu1 %v1606_v19 }
 0x1de   : > { %1819 = vmatmul.f32.gmra.mxu2 %v1606_v19 }
 0x1df   : > { %v2570_v50 = vpop.eup %2569  ;;  %v1542_v28 = vadd.f32 %v2568_v16, %v1541_v34  ;;  %v2308_v51 = vmul.f32 -1.442695, %v4140_v22  ;;  %v1659_v34 = vld [vmem:[%s4525_s6] sm:$0x7] }
 0x1e0   : > { %v2572_v13 = vpop.eup %2571  ;;  %v1401_v5 = vadd.f32 1.0, %v2570_v50  ;;  %v4154_v62 = vperm.slane %v1659_v34, 0 }
 0x1e1   : > { %v1546_v18 = vsel %vm1545_vm0, %v2568_v16, %v1542_v28  ;;  %v1554_v21 = vmul.f32 %v2572_v13, %v1400_v10  ;;  %2573 = vpow2.f32 %v2308_v51  ;;  %vm1559_vm2 = vweird.f32 %v2572_v13  ;;  %v1835_v28 = vld [vmem:[%s3324_s21] sm:$0xff]  ;;  %v1874_v51 = vld [vmem:[%s3324_s21 + $0x8] sm:$0xff] }
 0x1e2   : > { %v1551_v7 = vsel %vm1548_vm1, %v1550_v0, %v1546_v18  ;;  %2575 = vrcp.f32 %v1401_v5  ;;  %vm1560_vm4 = vmor %vm1558_vm3, %vm1559_vm2  ;;  %v1579_v42 = vand.u32 2147483648, %v1401_v5  ;;  %v1577_v56 = vand.u32 2147483647, %v1401_v5 }
 0x1e3   : > { %v1607_v48 = vmul.f32 %v1551_v7, %v4125_v53  ;;  %v1555_v4 = vsub.f32 1.0, %v1554_v21  ;;  %vm1573_vm7 = vweird.f32 %v1401_v5  ;;  %v1836_v7 = vld [vmem:[%s3324_s21 + $0x18] sm:$0xff] }
 0x1e4   : > { %v1580_v16 = vor.u32 1.1754944e-38, %v1579_v42  ;;  %vm1578_vm9 = vcmp.eq.f32.partialorder %v1577_v56, 8.507059e+37  ;;  %v1838_v42 = vld [vmem:[%s3324_s21 + $0x48] sm:$0xff]  ;;  %v1916_v56 = vld [vmem:[%s3324_s21 + $0x58] sm:$0xff] }
 0x1e5   : > { %v1556_v25 = vmul.f32 %v2572_v13, %v1555_v4  ;;  %1710 = vmatmul.f32.gmra.mxu0 %v1607_v48  ;;  %1766 = vmatmul.f32.gmra.mxu1 %v1607_v48  ;;  %v1914_v4 = vld [vmem:[%s3324_s21 + $0x28] sm:$0xff] }
 0x1e6   : > { %1822 = vmatmul.f32.gmra.mxu2 %v1607_v48  ;;  %v1875_v48 = vld [vmem:[%s3324_s21 + $0x20] sm:$0xff] }
 0x1e7   : > { %v2574_v31 = vpop.eup %2573  ;;  %v1557_v55 = vadd.f32 %v2572_v13, %v1556_v25 }
 0x1e8   : > { %v2576_v1 = vpop.eup %2575  ;;  %v1402_v35 = vadd.f32 1.0, %v2574_v31 }
 0x1e9   : > { %v1561_v46 = vsel %vm1560_vm4, %v2572_v13, %v1557_v55  ;;  %v1569_v43 = vmul.f32 %v2576_v1, %v1401_v5  ;;  %vm1574_vm6 = vweird.f32 %v2576_v1  ;;  %v1913_v13 = vld [vmem:[%s3324_s21 + $0x10] sm:$0xff] }
 0x1ea   : > { %v1566_v12 = vsel %vm1563_vm5, %v1565_v36, %v1561_v46  ;;  %2577 = vrcp.f32 %v1402_v35  ;;  %vm1575_vm8 = vmor %vm1573_vm7, %vm1574_vm6  ;;  %v1594_v3 = vand.u32 2147483648, %v1402_v35  ;;  %v1592_v9 = vand.u32 2147483647, %v1402_v35  ;;  %v1837_v55 = vld [vmem:[%s3324_s21 + $0x30] sm:$0xff]  ;;  %v1915_v36 = vld [vmem:[%s3324_s21 + $0x40] sm:$0xff] }
 0x1eb   : > { %v1608_v53 = vmul.f32 %v1566_v12, %v4130_v8  ;;  %v1570_v57 = vsub.f32 1.0, %v1569_v43  ;;  %vm1588_vm11 = vweird.f32 %v1402_v35  ;;  %v4179_v12 = vperm.slane %v1659_v34, 1 }
 0x1ec   : > { %v1595_v58 = vor.u32 1.1754944e-38, %v1594_v3  ;;  %vm1593_vm13 = vcmp.eq.f32.partialorder %v1592_v9, 8.507059e+37 }
 0x1ed   : > { %v1571_v45 = vmul.f32 %v2576_v1, %v1570_v57  ;;  %1713 = vmatmul.f32.gmra.mxu0 %v1608_v53  ;;  %1769 = vmatmul.f32.gmra.mxu1 %v1608_v53 }
 0x1ee   : > { %1825 = vmatmul.f32.gmra.mxu2 %v1608_v53 }
 0x1ef   : > { %v1572_v39 = vadd.f32 %v2576_v1, %v1571_v45  ;;  %v1877_v45 = vld [vmem:[%s3324_s21 + $0x50] sm:$0xff] }
 0x1f0   : > { %v2578_v59 = vpop.eup %2577 }
 0x1f1   : > { %v1576_v41 = vsel %vm1575_vm8, %v2576_v1, %v1572_v39  ;;  %v1584_v10 = vmul.f32 %v2578_v59, %v1402_v35  ;;  %vm1589_vm10 = vweird.f32 %v2578_v59  ;;  %v1876_v1 = vld [vmem:[%s3324_s21 + $0x38] sm:$0xff] }
 0x1f2   : > { %v1581_v24 = vsel %vm1578_vm9, %v1580_v16, %v1576_v41  ;;  %vm1590_vm12 = vmor %vm1588_vm11, %vm1589_vm10 }
 0x1f3   : > { %v1609_v40 = vmul.f32 %v1581_v24, %v4135_v32  ;;  %v1585_v8 = vsub.f32 1.0, %v1584_v10  ;;  %v4186_v10 = vperm.slane %v1659_v34, 2 }
 0x1f5   : > { %v1586_v47 = vmul.f32 %v2578_v59, %v1585_v8  ;;  %1716 = vmatmul.f32.gmra.mxu0 %v1609_v40  ;;  %1772 = vmatmul.f32.gmra.mxu1 %v1609_v40 }
 0x1f6   : > { %1828 = vmatmul.f32.gmra.mxu2 %v1609_v40 }
 0x1f7   : > { %v1587_v19 = vadd.f32 %v2578_v59, %v1586_v47 }
 0x1f9   : > { %v1591_v15 = vsel %vm1590_vm12, %v2578_v59, %v1587_v19 }
 0x1fa   : > { %v1596_v54 = vsel %vm1593_vm13, %v1595_v58, %v1591_v15  ;;  %v1839_v58 = vld [vmem:[%s3324_s21 + $0x60] sm:$0xff]  ;;  %v1878_v15 = vld [vmem:[%s3324_s21 + $0x68] sm:$0xff] }
 0x1fb   : > { %v1610_v32 = vmul.f32 %v1596_v54, %v4140_v22  ;;  %v1917_v54 = vld [vmem:[%s3324_s21 + $0x70] sm:$0xff] }
 0x1fd   : > { %1719 = vmatmul.f32.vlgmr.msrb.gmra.mxu3 %v1610_v32  ;;  %1739 = vmatmul.f32.vlgmr.msrb.gmra.mxu0 %v4057_v38 }
 0x1fe   : > { %1775 = vmatmul.f32.gmra.mxu1 %v1610_v32  ;;  %1831 = vmatmul.f32.gmra.mxu2 %v1610_v32 }
 0x205   : > { %1742 = vmatmul.f32.gmra.mxu0 %v4070_v30 }
 0x20d   : > { %1745 = vmatmul.f32.gmra.mxu0 %v4085_v23 }
 0x215   : > { %1795 = vmatmul.f32.vlgmr.msra.gmra.mxu0 %v4057_v38 }
 0x21a   : > { %v1684_v22 = vpop.f32.mrf.mxu0 }
 0x21b   : > { %v1685_v50 = vadd.f32 %v1684_v22, %v4154_v62 }
 0x21d   : > { %v1848_v0 = vmul.f32 %v1835_v28, %v1685_v50  ;;  %v1887_v5 = vmul.f32 %v1874_v51, %v1685_v50  ;;  %v1926_v18 = vmul.f32 %v1913_v13, %v1685_v50  ;;  %1798 = vmatmul.f32.gmra.mxu0 %v4070_v30 }
 0x21f   : > { %1861 = vst [vmem:[%s3324_s21] sm:$0xff] %v1848_v0 }
 0x220   : > { %1900 = vst [vmem:[%s3324_s21 + $0x8] sm:$0xff] %v1887_v5 }
 0x221   : > { %1939 = vst [vmem:[%s3324_s21 + $0x10] sm:$0xff] %v1926_v18 }
 0x222   : > { %v1687_v38 = vpop.f32.mrf.mxu0 }
 0x223   : > { %v1688_v21 = vadd.f32 %v1687_v38, %v4154_v62  ;;  %v1840_v38 = vld [vmem:[%s3324_s21 + $0x78] sm:$0xff] }
 0x225   : > { %v1849_v63 = vmul.f32 %v1836_v7, %v1688_v21  ;;  %v1888_v25 = vmul.f32 %v1875_v48, %v1688_v21  ;;  %v1927_v52 = vmul.f32 %v1914_v4, %v1688_v21  ;;  %1801 = vmatmul.f32.gmra.mxu0 %v4085_v23  ;;  %v1879_v21 = vld [vmem:[%s3324_s21 + $0x80] sm:$0xff]  ;;  %v1918_v7 = vld [vmem:[%s3324_s21 + $0x88] sm:$0xff] }
 0x227   : > { %1862 = vst [vmem:[%s3324_s21 + $0x18] sm:$0xff] %v1849_v63 }
 0x228   : > { %1901 = vst [vmem:[%s3324_s21 + $0x20] sm:$0xff] %v1888_v25 }
 0x229   : > { %1940 = vst [vmem:[%s3324_s21 + $0x28] sm:$0xff] %v1927_v52 }
 0x22a   : > { %v1690_v30 = vpop.f32.mrf.mxu0 }
 0x22b   : > { %v1691_v31 = vadd.f32 %v1690_v30, %v4154_v62 }
 0x22d   : > { %v1850_v35 = vmul.f32 %v1837_v55, %v1691_v31  ;;  %v1889_v46 = vmul.f32 %v1876_v1, %v1691_v31  ;;  %v1928_v43 = vmul.f32 %v1915_v36, %v1691_v31 }
 0x22f   : > { %1863 = vst [vmem:[%s3324_s21 + $0x30] sm:$0xff] %v1850_v35  ;;  %v1841_v35 = vld [vmem:[%s3324_s21 + $0x90] sm:$0xff] }
 0x230   : > { %1902 = vst [vmem:[%s3324_s21 + $0x38] sm:$0xff] %v1889_v46  ;;  %v1880_v46 = vld [vmem:[%s3324_s21 + $0x98] sm:$0xff] }
 0x231   : > { %1941 = vst [vmem:[%s3324_s21 + $0x40] sm:$0xff] %v1928_v43  ;;  %v1919_v43 = vld [vmem:[%s3324_s21 + $0xa0] sm:$0xff] }
 0x232   : > { %v1693_v23 = vpop.f32.mrf.mxu0  ;;  %v1749_v53 = vpop.f32.mrf.mxu1 }
 0x233   : > { %v1694_v57 = vadd.f32 %v1693_v23, %v4154_v62  ;;  %v1750_v41 = vadd.f32 %v1749_v53, %v4179_v12 }
 0x235   : > { %v1851_v39 = vmul.f32 %v1838_v42, %v1694_v57  ;;  %v1890_v59 = vmul.f32 %v1877_v45, %v1694_v57  ;;  %v1929_v16 = vmul.f32 %v1916_v56, %v1694_v57  ;;  %v1955_v40 = vmul.f32 %v1750_v41, %v3759_v27 }
 0x237   : > { %1864 = vst [vmem:[%s3324_s21 + $0x48] sm:$0xff] %v1851_v39 }
 0x238   : > { %1903 = vst [vmem:[%s3324_s21 + $0x50] sm:$0xff] %v1890_v59 }
 0x239   : > { %1942 = vst [vmem:[%s3324_s21 + $0x58] sm:$0xff] %v1929_v16  ;;  %v1805_v24 = vpop.f32.mrf.mxu2 }
 0x23a   : > { %v1806_v8 = vadd.f32 %v1805_v24, %v4186_v10  ;;  %v1696_v3 = vpop.f32.mrf.mxu0  ;;  %v1752_v47 = vpop.f32.mrf.mxu1  ;;  %v1842_v24 = vld [vmem:[%s3324_s21 + $0xa8] sm:$0xff] }
 0x23b   : > { %v1697_v9 = vadd.f32 %v1696_v3, %v4154_v62  ;;  %v1753_v27 = vadd.f32 %v1752_v47, %v4179_v12 }
 0x23c   : > { %v1968_v19 = vadd.f32 %v1955_v40, %v1806_v8  ;;  %v1881_v40 = vld [vmem:[%s3324_s21 + $0xb0] sm:$0xff]  ;;  %v1920_v8 = vld [vmem:[%s3324_s21 + $0xb8] sm:$0xff] }
 0x23d   : > { %v1852_v32 = vmul.f32 %v1839_v58, %v1697_v9  ;;  %v1891_v34 = vmul.f32 %v1878_v15, %v1697_v9  ;;  %v1930_v22 = vmul.f32 %v1917_v54, %v1697_v9  ;;  %v1956_v28 = vmul.f32 %v1753_v27, %v3781_v37  ;;  %v1843_v27 = vld [vmem:[%s3324_s21 + $0xc0] sm:$0xff] }
 0x23e   : > { %1981 = vst [vmem:[%s4198_s20 + $0x18] sm:$0xff] %v1968_v19 }
 0x23f   : > { %1865 = vst [vmem:[%s3324_s21 + $0x60] sm:$0xff] %v1852_v32 }
 0x240   : > { %1904 = vst [vmem:[%s3324_s21 + $0x68] sm:$0xff] %v1891_v34 }
 0x241   : > { %1943 = vst [vmem:[%s3324_s21 + $0x70] sm:$0xff] %v1930_v22  ;;  %v1808_v50 = vpop.f32.mrf.mxu2 }
 0x242   : > { %v1809_v51 = vadd.f32 %v1808_v50, %v4186_v10  ;;  %v1699_v13 = vpop.f32.mrf.mxu0  ;;  %v1755_v0 = vpop.f32.mrf.mxu1  ;;  %v1882_v50 = vld [vmem:[%s3324_s21 + $0xc8] sm:$0xff] }
 0x243   : > { %v1700_v5 = vadd.f32 %v1699_v13, %v4154_v62  ;;  %v1756_v37 = vadd.f32 %v1755_v0, %v4179_v12 }
 0x244   : > { %v1969_v18 = vadd.f32 %v1956_v28, %v1809_v51  ;;  %v1921_v28 = vld [vmem:[%s3324_s21 + $0xd0] sm:$0xff] }
 0x245   : > { %v1853_v48 = vmul.f32 %v1840_v38, %v1700_v5  ;;  %v1892_v4 = vmul.f32 %v1879_v21, %v1700_v5  ;;  %v1931_v63 = vmul.f32 %v1918_v7, %v1700_v5  ;;  %v1957_v52 = vmul.f32 %v1756_v37, %v3800_v33  ;;  %v1883_v37 = vld [vmem:[%s3324_s21 + $0xe0] sm:$0xff] }
 0x246   : > { %1982 = vst [vmem:[%s4198_s20 + $0x20] sm:$0xff] %v1969_v18 }
 0x247   : > { %1866 = vst [vmem:[%s3324_s21 + $0x78] sm:$0xff] %v1853_v48 }
 0x248   : > { %1905 = vst [vmem:[%s3324_s21 + $0x80] sm:$0xff] %v1892_v4 }
 0x249   : > { %1944 = vst [vmem:[%s3324_s21 + $0x88] sm:$0xff] %v1931_v63  ;;  %v1811_v25 = vpop.f32.mrf.mxu2  ;;  %v1844_v63 = vld [vmem:[%s3324_s21 + $0xd8] sm:$0xff] }
 0x24a   : > { %v1812_v30 = vadd.f32 %v1811_v25, %v4186_v10  ;;  %v1702_v31 = vpop.f32.mrf.mxu0  ;;  %v1758_v55 = vpop.f32.mrf.mxu1  ;;  %v1922_v25 = vld [vmem:[%s3324_s21 + $0xe8] sm:$0xff] }
 0x24b   : > { %v1703_v1 = vadd.f32 %v1702_v31, %v4154_v62  ;;  %v1759_v33 = vadd.f32 %v1758_v55, %v4179_v12 }
 0x24c   : > { %v1970_v36 = vadd.f32 %v1957_v52, %v1812_v30 }
 0x24d   : > { %v1854_v23 = vmul.f32 %v1841_v35, %v1703_v1  ;;  %v1893_v53 = vmul.f32 %v1880_v46, %v1703_v1  ;;  %v1932_v57 = vmul.f32 %v1919_v43, %v1703_v1  ;;  %v1958_v45 = vmul.f32 %v1759_v33, %v3829_v60  ;;  %v1923_v33 = vld [vmem:[%s3324_s21 + $0x100] sm:$0xff] }
 0x24e   : > { %1983 = vst [vmem:[%s4198_s20 + $0x28] sm:$0xff] %v1970_v36 }
 0x24f   : > { %1867 = vst [vmem:[%s3324_s21 + $0x90] sm:$0xff] %v1854_v23 }
 0x250   : > { %1906 = vst [vmem:[%s3324_s21 + $0x98] sm:$0xff] %v1893_v53  ;;  %v1845_v53 = vld [vmem:[%s3324_s21 + $0xf0] sm:$0xff] }
 0x251   : > { %1945 = vst [vmem:[%s3324_s21 + $0xa0] sm:$0xff] %v1932_v57  ;;  %v1814_v42 = vpop.f32.mrf.mxu2  ;;  %v1884_v57 = vld [vmem:[%s3324_s21 + $0xf8] sm:$0xff] }
 0x252   : > { %v1815_v56 = vadd.f32 %v1814_v42, %v4186_v10  ;;  %v1705_v39 = vpop.f32.mrf.mxu0  ;;  %v1761_v59 = vpop.f32.mrf.mxu1 }
 0x253   : > { %v1706_v16 = vadd.f32 %v1705_v39, %v4154_v62  ;;  %v1762_v60 = vadd.f32 %v1761_v59, %v4179_v12 }
 0x254   : > { %v1971_v41 = vadd.f32 %v1958_v45, %v1815_v56 }
 0x255   : > { %v1855_v3 = vmul.f32 %v1842_v24, %v1706_v16  ;;  %v1894_v47 = vmul.f32 %v1881_v40, %v1706_v16  ;;  %v1933_v9 = vmul.f32 %v1920_v8, %v1706_v16  ;;  %v1959_v58 = vmul.f32 %v1762_v60, %v3853_v29 }
 0x256   : > { %1984 = vst [vmem:[%s4198_s20 + $0x30] sm:$0xff] %v1971_v41 }
 0x257   : > { %1868 = vst [vmem:[%s3324_s21 + $0xa8] sm:$0xff] %v1855_v3  ;;  %v1846_v3 = vld [vmem:[%s3324_s21 + $0x108] sm:$0xff] }
 0x258   : > { %1907 = vst [vmem:[%s3324_s21 + $0xb0] sm:$0xff] %v1894_v47  ;;  %v1885_v47 = vld [vmem:[%s3324_s21 + $0x110] sm:$0xff] }
 0x259   : > { %1946 = vst [vmem:[%s3324_s21 + $0xb8] sm:$0xff] %v1933_v9  ;;  %v1817_v19 = vpop.f32.mrf.mxu2  ;;  %v1924_v9 = vld [vmem:[%s3324_s21 + $0x118] sm:$0xff] }
 0x25a   : > { %v1818_v15 = vadd.f32 %v1817_v19, %v4186_v10  ;;  %v1708_v54 = vpop.f32.mrf.mxu0  ;;  %v1764_v32 = vpop.f32.mrf.mxu1 }
 0x25b   : > { %v1709_v34 = vadd.f32 %v1708_v54, %v4154_v62  ;;  %v1765_v29 = vadd.f32 %v1764_v32, %v4179_v12 }
 0x25c   : > { %v1972_v22 = vadd.f32 %v1959_v58, %v1818_v15 }
 0x25d   : > { %v1856_v51 = vmul.f32 %v1843_v27, %v1709_v34  ;;  %v1895_v13 = vmul.f32 %v1882_v50, %v1709_v34  ;;  %v1934_v0 = vmul.f32 %v1921_v28, %v1709_v34  ;;  %v1960_v18 = vmul.f32 %v1765_v29, %v3861_v17  ;;  %v2579_v27 = vld [vmem:[%s3324_s21 + $0x130] sm:$0xff] }
 0x25e   : > { %1985 = vst [vmem:[%s4198_s20 + $0x38] sm:$0xff] %v1972_v22  ;;  %v1020_v50 = vmul.f32 %v2579_v27, %v3746_v20 }
 0x25f   : > { %1869 = vst [vmem:[%s3324_s21 + $0xc0] sm:$0xff] %v1856_v51 }
 0x260   : > { %1908 = vst [vmem:[%s3324_s21 + $0xc8] sm:$0xff] %v1895_v13  ;;  %v1033_v13 = vadd.f32 %v1020_v50, %v3866_v11 }
 0x261   : > { %1947 = vst [vmem:[%s3324_s21 + $0xd0] sm:$0xff] %v1934_v0  ;;  %v1820_v5 = vpop.f32.mrf.mxu2 }
 0x262   : > { %v1821_v38 = vadd.f32 %v1820_v5, %v4186_v10  ;;  %v1711_v21 = vpop.f32.mrf.mxu0  ;;  %v1767_v7 = vpop.f32.mrf.mxu1 }
 0x263   : > { %v1712_v48 = vadd.f32 %v1711_v21, %v4154_v62  ;;  %v1768_v17 = vadd.f32 %v1767_v7, %v4179_v12  ;;  %v1925_v21 = vld [vmem:[%s3324_s21 + $0x130] sm:$0xff] }
 0x264   : > { %v1973_v4 = vadd.f32 %v1960_v18, %v1821_v38  ;;  %v1847_v18 = vld [vmem:[%s3324_s21 + $0x120] sm:$0xff]  ;;  %v1886_v38 = vld [vmem:[%s3324_s21 + $0x128] sm:$0xff] }
 0x265   : > { %v1857_v52 = vmul.f32 %v1844_v63, %v1712_v48  ;;  %v1896_v30 = vmul.f32 %v1883_v37, %v1712_v48  ;;  %v1935_v31 = vmul.f32 %v1922_v25, %v1712_v48  ;;  %v1961_v1 = vmul.f32 %v1768_v17, %v3870_v26 }
 0x266   : > { %1986 = vst [vmem:[%s4198_s20 + $0x40] sm:$0xff] %v1973_v4 }
 0x267   : > { %1870 = vst [vmem:[%s3324_s21 + $0xd8] sm:$0xff] %v1857_v52 }
 0x268   : > { %1909 = vst [vmem:[%s3324_s21 + $0xe0] sm:$0xff] %v1896_v30 }
 0x269   : > { %1948 = vst [vmem:[%s3324_s21 + $0xe8] sm:$0xff] %v1935_v31  ;;  %v1823_v55 = vpop.f32.mrf.mxu2 }
 0x26a   : > { %v1824_v36 = vadd.f32 %v1823_v55, %v4186_v10  ;;  %v1714_v35 = vpop.f32.mrf.mxu0  ;;  %v1770_v46 = vpop.f32.mrf.mxu1 }
 0x26b   : > { %v1715_v43 = vadd.f32 %v1714_v35, %v4154_v62  ;;  %v1771_v26 = vadd.f32 %v1770_v46, %v4179_v12 }
 0x26c   : > { %v1974_v23 = vadd.f32 %v1961_v1, %v1824_v36  ;;  %v4546_v1 = vld [vmem:[#allocation9_spill] sm:$0xff] }
 0x26d   : > { %v1858_v42 = vmul.f32 %v1845_v53, %v1715_v43  ;;  %v1897_v45 = vmul.f32 %v1884_v57, %v1715_v43  ;;  %v1936_v56 = vmul.f32 %v1923_v33, %v1715_v43  ;;  %v1962_v59 = vmul.f32 %v1771_v26, %v3885_v14  ;;  %v4547_v43 = vld [vmem:[#allocation6_spill] sm:$0xff] }
 0x26e   : > { %1987 = vst [vmem:[%s4198_s20 + $0x48] sm:$0xff] %v1974_v23  ;;  %v788_v36 = vmul.f32 %v4546_v1, %v3378_v49  ;;  %v4548_v23 = vld [vmem:[#allocation7_spill] sm:$0xff] }
 0x26f   : > { %1871 = vst [vmem:[%s3324_s21 + $0xf0] sm:$0xff] %v1858_v42  ;;  %v579_v53 = vmul.f32 %v4548_v23, %v4547_v43 }
 0x270   : > { %1910 = vst [vmem:[%s3324_s21 + $0xf8] sm:$0xff] %v1897_v45 }
 0x271   : > { %1949 = vst [vmem:[%s3324_s21 + $0x100] sm:$0xff] %v1936_v56  ;;  %v1826_v39 = vpop.f32.mrf.mxu2  ;;  %v801_v42 = vadd.f32 %v788_v36, %v579_v53 }
 0x272   : > { %v1827_v16 = vadd.f32 %v1826_v39, %v4186_v10  ;;  %v1717_v41 = vpop.f32.mrf.mxu0  ;;  %v1773_v24 = vpop.f32.mrf.mxu1 }
 0x273   : > { %v1718_v40 = vadd.f32 %v1717_v41, %v4154_v62  ;;  %v1774_v15 = vadd.f32 %v1773_v24, %v4179_v12 }
 0x274   : > { %v1975_v8 = vadd.f32 %v1962_v59, %v1827_v16 }
 0x275   : > { %v1859_v60 = vmul.f32 %v1846_v3, %v1718_v40  ;;  %v1898_v19 = vmul.f32 %v1885_v47, %v1718_v40  ;;  %v1937_v58 = vmul.f32 %v1924_v9, %v1718_v40  ;;  %v1963_v54 = vmul.f32 %v1774_v15, %v3929_v61 }
 0x276   : > { %1988 = vst [vmem:[%s4198_s20 + $0x50] sm:$0xff] %v1975_v8 }
 0x277   : > { %1872 = vst [vmem:[%s3324_s21 + $0x108] sm:$0xff] %v1859_v60 }
 0x278   : > { %1911 = vst [vmem:[%s3324_s21 + $0x110] sm:$0xff] %v1898_v19 }
 0x279   : > { %1950 = vst [vmem:[%s3324_s21 + $0x118] sm:$0xff] %v1937_v58  ;;  %v1829_v14 = vpop.f32.mrf.mxu2 }
 0x27a   : > { %v1830_v32 = vadd.f32 %v1829_v14, %v4186_v10  ;;  %v1740_v34 = vpop.f32.mrf.mxu0 }
 0x27b   : > { %v1776_v22 = vpop.f32.mrf.mxu1 }
 0x27c   : > { %v1976_v28 = vadd.f32 %v1963_v54, %v1830_v32  ;;  %v1777_v51 = vadd.f32 %v1776_v22, %v4179_v12 }
 0x27e   : > { %1989 = vst [vmem:[%s4198_s20 + $0x58] sm:$0xff] %v1976_v28  ;;  %v1964_v5 = vmul.f32 %v1777_v51, %v1033_v13 }
 0x280   : > { %v1720_v0 = vpop.f32.mrf.mxu3 }
 0x281   : > { %v1721_v61 = vadd.f32 %v1720_v0, %v4154_v62  ;;  %v1832_v29 = vpop.f32.mrf.mxu2  ;;  %v1741_v62 = vadd.f32 %v1740_v34, %v4179_v12 }
 0x282   : > { %v1833_v20 = vadd.f32 %v1832_v29, %v4186_v10  ;;  %v1743_v7 = vpop.f32.mrf.mxu0 }
 0x283   : > { %v1860_v48 = vmul.f32 %v1847_v18, %v1721_v61  ;;  %v1899_v4 = vmul.f32 %v1886_v38, %v1721_v61  ;;  %v1938_v63 = vmul.f32 %v1925_v21, %v1721_v61  ;;  %v1952_v52 = vmul.f32 %v1741_v62, %v3653_v6  ;;  %v4549_v6 = vld [vmem:[#allocation8_spill] sm:$0xff] }
 0x284   : > { %v1977_v37 = vadd.f32 %v1964_v5, %v1833_v20  ;;  %v1744_v17 = vadd.f32 %v1743_v7, %v4179_v12  ;;  %v1010_v57 = vmul.f32 %v3713_v2, %v4549_v6 }
 0x285   : > { %1873 = vst [vmem:[%s3324_s21 + $0x120] sm:$0xff] %v1860_v48 }
 0x286   : > { %1912 = vst [vmem:[%s3324_s21 + $0x128] sm:$0xff] %v1899_v4  ;;  %v1953_v35 = vmul.f32 %v1744_v17, %v3688_v44  ;;  %v1023_v56 = vadd.f32 %v1010_v57, %v801_v42 }
 0x287   : > { %1951 = vst [vmem:[%s3324_s21 + $0x130] sm:$0xff] %v1938_v63 }
 0x288   : > { %1990 = vst [vmem:[%s4198_s20 + $0x60] sm:$0xff] %v1977_v37 }
 0x28a   : > { %v1746_v11 = vpop.f32.mrf.mxu0 }
 0x28b   : > { %v1747_v45 = vadd.f32 %v1746_v11, %v4179_v12 }
 0x28d   : > { %v1954_v39 = vmul.f32 %v1747_v45, %v1023_v56 }
 0x292   : > { %v1796_v25 = vpop.f32.mrf.mxu0 }
 0x293   : > { %v1797_v30 = vadd.f32 %v1796_v25, %v4186_v10 }
 0x295   : > { %v1965_v31 = vadd.f32 %v1952_v52, %v1797_v30 }
 0x297   : > { %1978 = vst [vmem:[%s4198_s20] sm:$0xff] %v1965_v31 }
 0x29a   : > { %v1799_v55 = vpop.f32.mrf.mxu0 }
 0x29b   : > { %v1800_v46 = vadd.f32 %v1799_v55, %v4186_v10 }
 0x29d   : > { %v1966_v33 = vadd.f32 %v1953_v35, %v1800_v46 }
 0x29f   : > { %1979 = vst [vmem:[%s4198_s20 + $0x8] sm:$0xff] %v1966_v33 }
 0x2a2   : > { %v1802_v26 = vpop.f32.mrf.mxu0 }
 0x2a3   : > { %v1803_v49 = vadd.f32 %v1802_v26, %v4186_v10  ;;  %2002 = sbr.rel (!%p2811_p5) target bundleno = 761 (0x2f9), region = 52 }
 0x2a5   : > { %v1967_v59 = vadd.f32 %v1954_v39, %v1803_v49 }
 0x2a7   : > { %1980 = vst [vmem:[%s4198_s20 + $0x10] sm:$0xff] %v1967_v59 }
 0x2a8   : > { %s4563_s23 = smov (!%p2005_p11, %s2004_s23), 13 }
 0x2a9   : > { %s2310_s24 = smul.u32 24, %s4563_s23 }
 0x2ab   : > { %p2313_p12 = scmp.eq.s32.totalorder %s2310_s24, 0 }
 0x2ac   : > { %2580 = sdivrem.u32 (!%p2313_p12), %s4563_s23, 11 }
 0x2ad   : > { %2015 = sbr.rel (%p2313_p12) target bundleno = 761 (0x2f9), region = 56 }
 0x2b5   : > { %s4329_s13 = spop.drf %2580 }
 0x2b6   : > { %s2582_s17 = spop.drf %2580  ;;  %p2314_p13 = scmp.le.s32.totalorder %s4329_s13, 0 }
 0x2b7   : > { %s4550_s26 = smov (!%p2314_p13), %s4323_s12  ;;  %s4551_s25 = smov (!%p2314_p13), %s3324_s21 }
 0x2b8   : > { %2231 = sbr.rel (%p2314_p13) target bundleno = 735 (0x2df), region = 124  ;;  %s4338_s10 = smov (!%p2314_p13), 0  }
 0x2b9   : > { %s4340_s22 = smov (!%p2314_p13), 0  }
 0x2bd LB: >> { %v2029_v44 = vld [vmem:[%s2699_s25] sm:$0xff]  ;;  %v2031_v2 = vld [vmem:[%s2699_s25 + $0x18] sm:$0xff]  ;;  %v2033_v12 = vld [vmem:[%s2699_s25 + $0x30] sm:$0xff]  ;;  %s2095_s24 = sadd.s32 1, %s2703_s10  ;;  %s2023_s22 = sadd.s32 1, %s2707_s22   ;;  %s2707_s22 = sphi %s4340_s22, %s2023_s22   ;;  %s2703_s10 = sphi %s4338_s10, %s4554_s10   ;;  %s2699_s25 = sphi %s4551_s25, %s4553_s25   ;;  %s2695_s26 = sphi %s4550_s26, %s4552_s26  }
 0x2be   : >> { %2030 = vst [vmem:[%s2695_s26] sm:$0xff] %v2029_v44  ;;  %v2035_v10 = vld [vmem:[%s2699_s25 + $0x48] sm:$0xff]  ;;  %p2096_p0 = scmp.ge.s32.totalorder %s2095_s24, %s4329_s13  ;;  %v2037_v16 = vld [vmem:[%s2699_s25 + $0x60] sm:$0xff]  ;;  %v2039_v41 = vld [vmem:[%s2699_s25 + $0x78] sm:$0xff]  ;;  %p2022_p1 = scmp.ge.s32.totalorder %s2023_s22, %s4329_s13 }
 0x2bf   : >> { %2032 = vst [vmem:[%s2695_s26 + $0x18] sm:$0xff] %v2031_v2  ;;  %v2041_v24 = vld [vmem:[%s2699_s25 + $0x90] sm:$0xff]  ;;  %v2043_v40 = vld [vmem:[%s2699_s25 + $0xa8] sm:$0xff]  ;;  %v2045_v8 = vld [vmem:[%s2699_s25 + $0xc0] sm:$0xff] }
 0x2c0   : >> { %2034 = vst [vmem:[%s2695_s26 + $0x30] sm:$0xff] %v2033_v12  ;;  %s4565_s24 = smov (%p2096_p0, %s2095_s24), 0  ;;  %v2047_v3 = vld [vmem:[%s2699_s25 + $0xd8] sm:$0xff]  ;;  %v2049_v47 = vld [vmem:[%s2699_s25 + $0xf0] sm:$0xff]  ;;  %v2051_v9 = vld [vmem:[%s2699_s25 + $0x8] sm:$0xff] }
 0x2c1   : >> { %2036 = vst [vmem:[%s2695_s26 + $0x48] sm:$0xff] %v2035_v10  ;;  %s2098_s17 = smul.u32 264, %s4565_s24  ;;  %v2053_v60 = vld [vmem:[%s2699_s25 + $0x20] sm:$0xff]  ;;  %v2055_v19 = vld [vmem:[%s2699_s25 + $0x38] sm:$0xff]  ;;  %v2057_v58 = vld [vmem:[%s2699_s25 + $0x50] sm:$0xff] }
 0x2c2   : >> { %2038 = vst [vmem:[%s2695_s26 + $0x60] sm:$0xff] %v2037_v16  ;;  %v2059_v15 = vld [vmem:[%s2699_s25 + $0x68] sm:$0xff]  ;;  %v2061_v14 = vld [vmem:[%s2699_s25 + $0x80] sm:$0xff]  ;;  %v2063_v54 = vld [vmem:[%s2699_s25 + $0x98] sm:$0xff] }
 0x2c3   : >> { %2040 = vst [vmem:[%s2695_s26 + $0x78] sm:$0xff] %v2039_v41  ;;  %s4374_s10 = scalar_lea.vmem %s3324_s21, %s2098_s17 [#allocation2]   ;;  %s4377_s0 = scalar_lea.vmem %s4323_s12, %s2098_s17   ;;  %v2065_v32 = vld [vmem:[%s2699_s25 + $0xb0] sm:$0xff]  ;;  %v2067_v34 = vld [vmem:[%s2699_s25 + $0xc8] sm:$0xff]  ;;  %v2069_v22 = vld [vmem:[%s2699_s25 + $0xe0] sm:$0xff] }
 0x2c4   : >> { %2042 = vst [vmem:[%s2695_s26 + $0x90] sm:$0xff] %v2041_v24  ;;  %v2071_v27 = vld [vmem:[%s2699_s25 + $0xf8] sm:$0xff]  ;;  %v2073_v50 = vld [vmem:[%s2699_s25 + $0x10] sm:$0xff]  ;;  %v2075_v28 = vld [vmem:[%s2699_s25 + $0x28] sm:$0xff] }
 0x2c5   : >> { %2044 = vst [vmem:[%s2695_s26 + $0xa8] sm:$0xff] %v2043_v40  ;;  %v2077_v51 = vld [vmem:[%s2699_s25 + $0x40] sm:$0xff]  ;;  %v2079_v13 = vld [vmem:[%s2699_s25 + $0x58] sm:$0xff]  ;;  %v2081_v0 = vld [vmem:[%s2699_s25 + $0x70] sm:$0xff] }
 0x2c6   : >> { %2046 = vst [vmem:[%s2695_s26 + $0xc0] sm:$0xff] %v2045_v8  ;;  %v2083_v61 = vld [vmem:[%s2699_s25 + $0x88] sm:$0xff]  ;;  %v2085_v29 = vld [vmem:[%s2699_s25 + $0xa0] sm:$0xff]  ;;  %v2087_v5 = vld [vmem:[%s2699_s25 + $0xb8] sm:$0xff] }
 0x2c7   : >> { %2048 = vst [vmem:[%s2695_s26 + $0xd8] sm:$0xff] %v2047_v3  ;;  %v2089_v18 = vld [vmem:[%s2699_s25 + $0xd0] sm:$0xff]  ;;  %v2091_v38 = vld [vmem:[%s2699_s25 + $0xe8] sm:$0xff]  ;;  %v2093_v21 = vld [vmem:[%s2699_s25 + $0x100] sm:$0xff]  ;;  %s4553_s25 = smov %s4374_s10  ;;  %s4554_s10 = smov %s4565_s24 }
 0x2c8   : >> { %2050 = vst [vmem:[%s2695_s26 + $0xf0] sm:$0xff] %v2049_v47 }
 0x2c9   : >> { %2052 = vst [vmem:[%s2695_s26 + $0x8] sm:$0xff] %v2051_v9 }
 0x2ca   : >> { %2054 = vst [vmem:[%s2695_s26 + $0x20] sm:$0xff] %v2053_v60 }
 0x2cb   : >> { %2056 = vst [vmem:[%s2695_s26 + $0x38] sm:$0xff] %v2055_v19 }
 0x2cc   : >> { %2058 = vst [vmem:[%s2695_s26 + $0x50] sm:$0xff] %v2057_v58 }
 0x2cd   : >> { %2060 = vst [vmem:[%s2695_s26 + $0x68] sm:$0xff] %v2059_v15 }
 0x2ce   : >> { %2062 = vst [vmem:[%s2695_s26 + $0x80] sm:$0xff] %v2061_v14 }
 0x2cf   : >> { %2064 = vst [vmem:[%s2695_s26 + $0x98] sm:$0xff] %v2063_v54 }
 0x2d0   : >> { %2066 = vst [vmem:[%s2695_s26 + $0xb0] sm:$0xff] %v2065_v32 }
 0x2d1   : >> { %2068 = vst [vmem:[%s2695_s26 + $0xc8] sm:$0xff] %v2067_v34 }
 0x2d2   : >> { %2070 = vst [vmem:[%s2695_s26 + $0xe0] sm:$0xff] %v2069_v22 }
 0x2d3   : >> { %2072 = vst [vmem:[%s2695_s26 + $0xf8] sm:$0xff] %v2071_v27 }
 0x2d4   : >> { %2074 = vst [vmem:[%s2695_s26 + $0x10] sm:$0xff] %v2073_v50 }
 0x2d5   : >> { %2076 = vst [vmem:[%s2695_s26 + $0x28] sm:$0xff] %v2075_v28 }
 0x2d6   : >> { %2078 = vst [vmem:[%s2695_s26 + $0x40] sm:$0xff] %v2077_v51 }
 0x2d7   : >> { %2080 = vst [vmem:[%s2695_s26 + $0x58] sm:$0xff] %v2079_v13 }
 0x2d8   : >> { %2082 = vst [vmem:[%s2695_s26 + $0x70] sm:$0xff] %v2081_v0 }
 0x2d9   : >> { %2084 = vst [vmem:[%s2695_s26 + $0x88] sm:$0xff] %v2083_v61 }
 0x2da   : >> { %2086 = vst [vmem:[%s2695_s26 + $0xa0] sm:$0xff] %v2085_v29  ;;  %2025 = sbr.rel (!%p2022_p1) target bundleno = 701 (0x2bd), region = 130 }
 0x2db   : >> { %2088 = vst [vmem:[%s2695_s26 + $0xb8] sm:$0xff] %v2087_v5 }
 0x2dc   : >> { %2090 = vst [vmem:[%s2695_s26 + $0xd0] sm:$0xff] %v2089_v18 }
 0x2dd   : >> { %2092 = vst [vmem:[%s2695_s26 + $0xe8] sm:$0xff] %v2091_v38 }
 0x2de   : >> { %2094 = vst [vmem:[%s2695_s26 + $0x100] sm:$0xff] %v2093_v21  ;;  %s4552_s26 = smov %s4377_s0 }
 0x2df PF: > { %2583 = sdivrem.u32 %s4563_s23, 11 }
 0x2e0   : > { %s2315_s17 = smul.u32 264, %s4329_s13 }
 0x2e2   : > { %s4444_s1 = scalar_lea.vmem %s3324_s21, %s2315_s17 [#allocation2]   ;;  %s4447_s2 = scalar_lea.vmem %s4323_s12, %s2315_s17  }
 0x2e8   : > { %s2584_s3 = spop.drf %2583 }
 0x2e9   : > { %s4449_s0 = spop.drf %2583 }
 0x2ea   : > { %p2317_p2 = scmp.le.s32.totalorder %s4449_s0, 0 }
 0x2eb   : > { %s2709_s22 = smov (!%p2317_p2), %s4447_s2   ;;  %s2713_s26 = smov (!%p2317_p2), %s4444_s1  }
 0x2ec   : > { %2245 = sbr.rel (%p2317_p2) target bundleno = 761 (0x2f9), region = 135  ;;  %s2717_s25 = smov (!%p2317_p2), 0  }
 0x2ed   : > { %s2721_s24 = smov (!%p2317_p2), 0  }
 0x2f1 LB: >> { %v2118_v20 = vld [vmem:[%s2715_s26] sm:$0xff]  ;;  %v2120_v7 = vld [vmem:[%s2715_s26 + $0x8] sm:$0xff]  ;;  %v2122_v48 = vld [vmem:[%s2715_s26 + $0x10] sm:$0xff]  ;;  %s2124_s3 = sadd.s32 1, %s2719_s25  ;;  %s2112_s24 = sadd.s32 1, %s2723_s24   ;;  %s2723_s24 = sphi %s2721_s24, %s2112_s24   ;;  %s2719_s25 = sphi %s2717_s25, %s2718_s25   ;;  %s2715_s26 = sphi %s2713_s26, %s2129_s26   ;;  %s2711_s22 = sphi %s2709_s22, %s2130_s22  }
 0x2f2   : >> { %2119 = vst [vmem:[%s2711_s22] sm:$0xff] %v2118_v20  ;;  %p2125_p3 = scmp.ge.s32.totalorder %s2124_s3, %s4449_s0  ;;  %p2111_p4 = scmp.ge.s32.totalorder %s2112_s24, %s4449_s0 }
 0x2f3   : >> { %2121 = vst [vmem:[%s2711_s22 + $0x8] sm:$0xff] %v2120_v7 }
 0x2f4   : >> { %2123 = vst [vmem:[%s2711_s22 + $0x10] sm:$0xff] %v2122_v48  ;;  %s4567_s3 = smov (%p2125_p3, %s2124_s3), 0  ;;  %2114 = sbr.rel (!%p2111_p4) target bundleno = 753 (0x2f1), region = 141 }
 0x2f5   : >> { %s2127_s21 = smul.u32 24, %s4567_s3  ;;  %s2718_s25 = smov %s4567_s3  }
 0x2f7   : >> { %s2129_s26 = scalar_lea.vmem %s4444_s1, %s2127_s21 [#allocation2]   ;;  %s2130_s22 = scalar_lea.vmem %s4447_s2, %s2127_s21  }
 0x2f9 PF: > { %2136 = sbr.rel (!%p2811_p5) target bundleno = 798 (0x31e), region = 82  ;;  %s2138_s23 = ssub.s32 (%p2811_p5), 25, %s2914_s19 }
 0x2fa   : > { %p2139_p7 = scmp.lt.s32.totalorder (%p2811_p5), %s2138_s23, 13  ;;  %s4555_s17 = scalar_lea.sflag (%p2811_p5), [#allocation4], %s3305_s18 }
 0x2fe   : > { %s4569_s23 = smov (!%p2139_p7, %s2138_s23), 13 }
 0x2ff   : > { %s2318_s12 = sshll.u32 %s4569_s23, 3 }
 0x300   : > { %s2142_s13 = ssub.s32 104, %s2318_s12 }
 0x301   : > { %s2143_s10 = sshll.u32 %s2142_s13, 4 }
 0x302   : > { %2144 = vsyncadd %s4555_s17, %s2143_s10  ;;  %p4466_p8 = scmp.ne.s32.totalorder %s2318_s12, 0  ;;  %s2325_s2 = smul.u32 104, %s2794_s9 }
 0x303   : > { %s2149_s15 = sshll.u32 %s4198_s20, 4  ;;  %s2322_s19 = sshll.u32 %s4569_s23, 7  ;;  %s4476_s15 = int_to_ptr.vmem [resolvable:$true] %s2149_s15 }
 0x304   : > { %s2147_s26 = scalar_lea.hbm %s4527_s8, %s2325_s2  ;;  %s2586_s24 = sshra.s32 %s4476_s15, 4  ;;  %s2587_s24 = int_to_ptr.vmem [resolvable:$true] %s2586_s24 }
 0x305   : > { %s2151_s25 = sshll.u32 %s2147_s26, 4  ;;  %s2588_s3 = sshrl.u32 %s2322_s19, 4  ;;  %s4478_s25 = int_to_ptr.hbm [resolvable:$true] %s2151_s25 }
 0x306   : > { %s2593_s21 = scalar_lea.vmem %s2587_s24, %s2588_s3  ;;  %s2725_s9 = smov [#allocation3]  }
 0x307   : > { %p2594_p5 = scmp.ne.s32.totalorder %s2587_s24, %s2593_s21  ;;  %s2597_s20 = scalar_lea.vmem %s2725_s9, 208 }
 0x308   : > { %p2599_p11 = scmp.lt.s32.totalorder %s2597_s20, %s2593_s21 }
 0x309   : > { %p2595_p9 = pnand %p2594_p5, %p4466_p8 }
 0x30b   : > { %p2596_p10 = pneg %p2595_p9 }
 0x30d   : > { %p2601_p12 = pnand %p2599_p11, %p2596_p10 }
 0x30f   : > { %2604 = shalt.err (!%p2601_p12)
}
 0x310   : > { %s2605_s12 = sshra.s32 %s4478_s25, 4  ;;  %s2616_s2 = scalar_lea.hbm %s4527_s8, 200  ;;  %s2606_s12 = int_to_ptr.hbm [resolvable:$true] %s2605_s12 }
 0x311   : > { %s2612_s13 = scalar_lea.hbm %s2606_s12, %s2588_s3  ;;  %p2617_p2 = scmp.lt.s32.totalorder %s2606_s12, %s4527_s8 }
 0x312   : > { %p2613_p13 = scmp.ne.s32.totalorder %s2606_s12, %s2612_s13  ;;  %p2618_p3 = scmp.lt.s32.totalorder %s2616_s2, %s2612_s13 }
 0x314   : > { %p2614_p0 = pnand %p2613_p13, %p4466_p8  ;;  %p2619_p4 = por %p2618_p3, %p2617_p2 }
 0x316   : > { %p2615_p1 = pneg %p2614_p0 }
 0x318   : > { %p2620_p7 = pnand %p2619_p4, %p2615_p1 }
 0x31a   : > { %2623 = shalt.err (!%p2620_p7)
}
 0x31b   : > { %s2726_s26 = smov 128   ;;  %s2727_s24 = smov 8  }
 0x31c   : > { %s4557_s3 = scalar_lea.sflag [#allocation4], %s3305_s18 }
 0x31d   : > { %2157 = dma.vmem_to_hbm [thread:$0]  (%p4466_p8), %s4476_s15, %s2322_s19, %s4478_s25, %s4557_s3, %s2726_s26, %s2726_s26, %s2727_s24  }
 0x31e PF: > { %p2400_p5 = scmp.ge.s32.totalorder %s2691_s30, 2  ;;  %s2173_s21 = sand.u32 1, %s2679_s27  }
 0x31f   : > { %s2174_s9 = scalar_lea.sflag [#allocation4], %s2173_s21 }
 0x320   : > { %p2396_p9 = pnand %p2400_p5, %p2815_p6 }
 0x322   : > { %p2397_p10 = pneg %p2396_p9 }
 0x324   : > { %2674 = dma.done.wait (%p2397_p10), %s2174_s9, 1664  }
 0x325   : > { %2676 = vsyncadd (%p2397_p10), %s2174_s9, 4294965632  ;;  %p19_p11 = scmp.ge.s32.totalorder %s2798_s11, 4   ;;  %s4558_s27 = smov %s2683_s28 }
 0x326   : > { %s4559_s28 = smov %s2687_s29  ;;  %s4560_s29 = smov %s2809_s14 }
 0x327   : > { %s4561_s30 = smov %s2798_s11  ;;  %21 = sbr.rel (!%p19_p11) target bundleno = 8 (0x8), region = 152 }
 0x32c   :  { %2180 = vsyncpa [#allocation4], 1 }
 0x32d   :  { %2182 = vsyncpa [#allocation4 + $0x1], 1 }

</bundles_post_ra>
